<compile_context>
chip_gen: v5e
topology: v5e:2x2
jax: 0.10.0
libtpu: 0.0.40
codegen_flags: <defaults>
</compile_context>

<pallas_src>
import functools

import jax
import jax.numpy as jnp
from jax import lax
from jax.experimental import pallas as pl
from jax.experimental.pallas import tpu as pltpu


def _tiling(m):
    """block_m (multiple of 128, <=1024), padded frame count, #blocks."""
    m128 = -(-m // 128) * 128
    block_m = min(1024, m128)
    m_pad = -(-m // block_m) * block_m
    return block_m, m_pad, m_pad // block_m


def _pad_lanes(x, m_pad):
    """Zero-pad the last (frame/lane) axis of x up to m_pad."""
    m = x.shape[-1]
    if m_pad == m:
        return x
    pad = [(0, 0)] * (x.ndim - 1) + [(0, m_pad - m)]
    return jnp.pad(x, pad)


@functools.lru_cache(maxsize=None)
def _build_fused_call(m, has_pred_rot, has_pred_full, has_gt_full):
    """Fused Pose_Loss forward kernel for M = B*T frames (frames on lanes).

    Kernel refs (presence depends on flags, in this order):
      pose_t     (3, 24, M_pad)   gt axis-angle (axis, joint, frame) [need_rot]
      pred_rot_t (216, M_pad)     pred rotmats, row = c*24 + j       [has_pred_rot]
      w          (72, 216)        regressor, col = c*24 + j          [need_rot]
      gt_full_t  (72, M_pad)      provided gt joints                 [has_gt_full]
      pred_full_t(72, M_pad)      predicted full joints              [has_pred_full]
    Outputs:
      losses     (3, n_blocks) SMEM partial SSEs [param, smpl_joints, full_joints]
      joints_t   (72, M_pad)      predicted SMPL joints              [has_pred_rot]
    Scratch:
      stack      (216, block_m) VMEM — gt Rodrigues components       [need_rot]
    """
    need_rot = has_pred_rot or not has_gt_full
    block_m, m_pad, n_blocks = _tiling(m)
    needs_mask = (m_pad != m)

    def kernel(*refs):
        refs = list(refs)
        pose_ref = refs.pop(0) if need_rot else None
        pred_rot_ref = refs.pop(0) if has_pred_rot else None
        w_ref = refs.pop(0) if need_rot else None
        gt_full_ref = refs.pop(0) if has_gt_full else None
        pred_full_ref = refs.pop(0) if has_pred_full else None
        loss_ref = refs.pop(0)
        joints_ref = refs.pop(0) if has_pred_rot else None
        stack_ref = refs.pop(0) if need_rot else None

        step = pl.program_id(0)

        # Lane mask for the zero-padded tail frames (only the losses need it).
        if needs_mask:
            col = step * block_m + lax.broadcasted_iota(
                jnp.int32, (1, block_m), 1)
            mask = (col < m).astype(jnp.float32)
        else:
            mask = None

        def masked_sse(d):
            dsq = d * d
            if mask is not None:
                dsq = dsq * mask
            return jnp.sum(dsq)

        # ---- Rodrigues on the gt pose: (24, block_m) lane-dense slabs ------
        gt_stack = None
        if need_rot:
            x = pose_ref[0]                      # (24, block_m)
            y = pose_ref[1]
            z = pose_ref[2]
            sq = x * x + y * y + z * z + 1e-8
            inv = lax.rsqrt(sq)                  # EUP
            angle = sq * inv                     # == sqrt(sq)
            ux, uy, uz = x * inv, y * inv, z * inv
            ca = jnp.cos(angle)
            sa = jnp.sin(angle)
            t = 1.0 - ca
            comps = (
                t * ux * ux + ca, t * ux * uy - sa * uz, t * ux * uz + sa * uy,
                t * ux * uy + sa * uz, t * uy * uy + ca, t * uy * uz - sa * ux,
                t * ux * uz - sa * uy, t * uy * uz + sa * ux, t * uz * uz + ca,
            )
            # Sublane-aligned slab stores (24 % 8 == 0): stack row = c*24 + j.
            for c in range(9):
                stack_ref[pl.ds(c * 24, 24), :] = comps[c]
            gt_stack = stack_ref[...]            # (216, block_m)

        # ---- SMPL joint regressor: single K=216 MXU dot per operand --------
        if has_gt_full:
            gt_full = gt_full_ref[...]           # (72, block_m)
        else:
            gt_full = jnp.dot(w_ref[...], gt_stack,
                              preferred_element_type=jnp.float32)

        sse_param = jnp.float32(0.0)
        sse_smpl = jnp.float32(0.0)
        sse_full = jnp.float32(0.0)

        if has_pred_rot:
            pred_stack = pred_rot_ref[...]       # (216, block_m)
            sse_param = masked_sse(pred_stack - gt_stack)
            j_pred = jnp.dot(w_ref[...], pred_stack,
                             preferred_element_type=jnp.float32)
            sse_smpl = masked_sse(j_pred - gt_full)
            joints_ref[...] = j_pred             # lane-dense (72, block_m)
        if has_pred_full:
            sse_full = masked_sse(pred_full_ref[...] - gt_full)

        # Per-block partial SSEs; wrapper does the final sum + scaling.
        loss_ref[0, step] = sse_param
        loss_ref[1, step] = sse_smpl
        loss_ref[2, step] = sse_full

    in_specs = []
    if need_rot:
        in_specs.append(pl.BlockSpec((3, 24, block_m), lambda i: (0, 0, i)))
    if has_pred_rot:
        in_specs.append(pl.BlockSpec((216, block_m), lambda i: (0, i)))
    if need_rot:
        in_specs.append(pl.BlockSpec((72, 216), lambda i: (0, 0)))
    if has_gt_full:
        in_specs.append(pl.BlockSpec((72, block_m), lambda i: (0, i)))
    if has_pred_full:
        in_specs.append(pl.BlockSpec((72, block_m), lambda i: (0, i)))

    out_shape = [jax.ShapeDtypeStruct((3, n_blocks), jnp.float32)]
    out_specs = [pl.BlockSpec(memory_space=pltpu.MemorySpace.SMEM)]
    if has_pred_rot:
        out_shape.append(jax.ShapeDtypeStruct((72, m_pad), jnp.float32))
        out_specs.append(pl.BlockSpec((72, block_m), lambda i: (0, i)))

    scratch_shapes = []
    if need_rot:
        scratch_shapes.append(pltpu.VMEM((216, block_m), jnp.float32))

    return pl.pallas_call(
        kernel,
        out_shape=tuple(out_shape),
        grid=(n_blocks,),
        in_specs=in_specs,
        out_specs=tuple(out_specs),
        scratch_shapes=scratch_shapes,
        compiler_params=pltpu.CompilerParams(
            dimension_semantics=("arbitrary",),
        ),
    )


class PoseLoss:
    """JAX/Pallas port of Pose_Loss.forward (one fused TPU kernel)."""

    def __init__(self, ZMP, BONE, key):
        self.ZMP = ZMP
        self.BONE = BONE
        # TODO(synk): the real SMPL model (shape blendshapes + LBS + vertex
        # joint regressor) is not reproducible from the snippet; replaced by a
        # deterministic linear joint regressor (24*9 -> 24*3) on flattened
        # rotation matrices.  w_smpl rows are (joint, component)-major like
        # the reference flatten of (24,3,3).
        self.w_smpl = 0.01 * jax.random.normal(key, (24 * 9, 24 * 3),
                                               jnp.float32)
        # Kernel copy: w_cmaj[o, c*24 + j] == w_smpl[j*9 + c, o]
        self.w_cmaj = jnp.transpose(
            self.w_smpl.reshape(24, 9, 72), (2, 1, 0)).reshape(72, 216)

    def __call__(self, kw):
        B, T = kw['human_points'].shape[:2]
        m = B * T
        has_pred_rot = 'pred_rotmats' in kw
        has_pred_full = 'pred_full_joints' in kw
        has_gt_full = 'full_joints' in kw

        details, others = {}, {}
        if not (has_pred_rot or has_pred_full):
            return details, others

        need_rot = has_pred_rot or not has_gt_full
        _, m_pad, _ = _tiling(m)
        fused = _build_fused_call(m, has_pred_rot, has_pred_full, has_gt_full)

        # Wrapper-side relayouts: one transpose + zero-pad per tensor, putting
        # frames on the lane (last) axis.  Everything downstream stays in VMEM.
        inputs = []
        if need_rot:
            pose_t = jnp.transpose(
                kw['pose'].astype(jnp.float32).reshape(m, 24, 3), (2, 1, 0))
            inputs.append(_pad_lanes(pose_t, m_pad))            # (3, 24, M_pad)
        if has_pred_rot:
            pr = jnp.transpose(
                kw['pred_rotmats'].astype(jnp.float32).reshape(m, 24, 9),
                (2, 1, 0)).reshape(216, m)
            inputs.append(_pad_lanes(pr, m_pad))                # (216, M_pad)
        if need_rot:
            inputs.append(self.w_cmaj)                          # (72, 216)
        if has_gt_full:
            gf = jnp.transpose(
                jax.lax.stop_gradient(kw['full_joints']).astype(
                    jnp.float32).reshape(m, 72), (1, 0))
            inputs.append(_pad_lanes(gf, m_pad))                # (72, M_pad)
        if has_pred_full:
            pf = jnp.transpose(
                kw['pred_full_joints'].astype(jnp.float32).reshape(m, 72),
                (1, 0))
            inputs.append(_pad_lanes(pf, m_pad))                # (72, M_pad)

        outs = fused(*inputs)
        sse = jnp.sum(outs[0], axis=1)          # (3,) summed partial SSEs
        param_scale = 1.0 / float(m * 24 * 9)
        joint_scale = 1.0 / float(m * 24 * 3)

        if has_pred_rot:
            details['loss_param'] = sse[0] * param_scale
            details['loss_smpl_joints'] = sse[1] * joint_scale
            others['pred_smpl_joints'] = jnp.transpose(
                outs[1][:, :m], (1, 0)).reshape(B, T, 24, 3)
            if self.ZMP:
                # TODO(synk): Zmp_Loss definition not provided in the module.
                pass
            if self.BONE:
                # TODO(synk): Bone_Loss definition not provided in the module.
                pass
        if has_pred_full:
            details['loss_full_joints'] = sse[2] * joint_scale
        return details, others


# --------------------------------------------------------------------------
# Pure-jnp reference helpers (test-input construction + sanity check only).
# --------------------------------------------------------------------------
def _rodrigues_ref(aa):
    """(N, 3) axis-angle -> (N, 3, 3) rotation matrices."""
    sq = jnp.sum(aa * aa, axis=-1) + 1e-8
    angle = jnp.sqrt(sq)
    u = aa / angle[:, None]
    ux, uy, uz = u[:, 0], u[:, 1], u[:, 2]
    c = jnp.cos(angle)
    s = jnp.sin(angle)
    t = 1.0 - c
    rows = jnp.stack([
        t * ux * ux + c, t * ux * uy - s * uz, t * ux * uz + s * uy,
        t * ux * uy + s * uz, t * uy * uy + c, t * uy * uz - s * ux,
        t * ux * uz - s * uy, t * uy * uz + s * ux, t * uz * uz + c,
    ], axis=-1)
    return rows.reshape(-1, 3, 3)


if __name__ == "__main__":
    key = jax.random.PRNGKey(0)
    k1, k2, k3, k4 = jax.random.split(key, 4)
    B, T = 2, 8  # M = B*T = 16 frames, 24 joints each

    pose = 0.5 * jax.random.normal(k1, (B, T, 24 * 3), jnp.float32)
    human_points = jax.random.normal(k2, (B, T, 8, 3), jnp.float32)
    pred_pose = pose + 0.1 * jax.random.normal(k3, pose.shape, jnp.float32)
    pred_rotmats = _rodrigues_ref(pred_pose.reshape(-1, 3)).reshape(B, T, 24, 3, 3)
    pred_full_joints = 0.1 * jax.random.normal(k4, (B, T, 24, 3), jnp.float32)

    loss_mod = PoseLoss(ZMP=False, BONE=False, key=jax.random.PRNGKey(42))
    kw = {
        'human_points': human_points,
        'pose': pose,
        'pred_rotmats': pred_rotmats,
        'pred_full_joints': pred_full_joints,
    }
    details, others = loss_mod(kw)
    jax.block_until_ready(details)
    jax.block_until_ready(others)

    # ---- pure-jnp reference sanity check ----
    gt_rotmats = _rodrigues_ref(pose.reshape(-1, 3)).reshape(B, T, 24, 3, 3)
    gt_full_joints = (gt_rotmats.reshape(B * T, 216) @ loss_mod.w_smpl
                      ).reshape(B, T, 24, 3)
    pred_smpl_ref = (pred_rotmats.reshape(B * T, 216) @ loss_mod.w_smpl
                     ).reshape(B, T, 24, 3)
    ref = {
        'loss_param': jnp.mean((pred_rotmats - gt_rotmats) ** 2),
        'loss_smpl_joints': jnp.mean((pred_smpl_ref - gt_full_joints) ** 2),
        'loss_full_joints': jnp.mean((pred_full_joints - gt_full_joints) ** 2),
    }

    for k, v in details.items():
        assert v.shape == () and bool(jnp.isfinite(v)), k
        assert bool(jnp.allclose(v, ref[k], rtol=5e-2, atol=1e-5)), (
            k, float(v), float(ref[k]))
    assert others['pred_smpl_joints'].shape == (B, T, 24, 3)
    assert bool(jnp.allclose(others['pred_smpl_joints'], pred_smpl_ref,
                             rtol=5e-2, atol=1e-3))
    print("KERNEL_OK")
</pallas_src>

<mosaic_0001>
module attributes {stable_mosaic.version = 11 : i64} {
  func.func @kernel(%arg0: i32, %arg1: memref<3x24x128xf32, #tpu.memory_space<vmem>>, %arg2: memref<216x128xf32, #tpu.memory_space<vmem>>, %arg3: memref<72x216xf32, #tpu.memory_space<vmem>>, %arg4: memref<72x128xf32, #tpu.memory_space<vmem>>, %arg5: memref<3x1xf32, #tpu.memory_space<smem>>, %arg6: memref<72x128xf32, #tpu.memory_space<vmem>>, %arg7: memref<216x128xf32, #tpu.memory_space<vmem>>) attributes {dimension_semantics = [#tpu.dimension_semantics<arbitrary>], iteration_bounds = array<i64: 1>, scalar_prefetch = 0 : i64, scratch_operands = 1 : i64, tpu.core_type = #tpu.core_type<tc>, window_params = [{transform_indices = @transform_0, window_bounds = array<i64: 3, 24, 128>}, {transform_indices = @transform_1, window_bounds = array<i64: 216, 128>}, {pipeline_mode = #tpu.pipeline_mode<synchronous>, transform_indices = @transform_2, window_bounds = array<i64: 72, 216>}, {transform_indices = @transform_3, window_bounds = array<i64: 72, 128>}, {transform_indices = @transform_4, window_bounds = array<i64: 3, 1>}, {transform_indices = @transform_5, window_bounds = array<i64: 72, 128>}]} {
    %c128_i32 = arith.constant 128 : i32
    %0 = arith.muli %arg0, %c128_i32 : i32
    %1 = tpu.iota {dimensions = array<i32: 1>} : vector<1x128xi32>
    %2 = vector.broadcast %0 : i32 to vector<1x128xi32>
    %3 = arith.addi %2, %1 : vector<1x128xi32>
    %c16_i32 = arith.constant 16 : i32
    %4 = vector.broadcast %c16_i32 : i32 to vector<1x128xi32>
    %5 = arith.cmpi slt, %3, %4 : vector<1x128xi32>
    %6 = arith.extui %5 : vector<1x128xi1> to vector<1x128xi32>
    %7 = arith.sitofp %6 : vector<1x128xi32> to vector<1x128xf32>
    %c0 = arith.constant 0 : index
    %c0_0 = arith.constant 0 : index
    %c0_1 = arith.constant 0 : index
    %8 = vector.load %arg1[%c0, %c0_0, %c0_1] : memref<3x24x128xf32, #tpu.memory_space<vmem>>, vector<1x24x128xf32>
    %9 = vector.shape_cast %8 : vector<1x24x128xf32> to vector<24x128xf32>
    %c1 = arith.constant 1 : index
    %c0_2 = arith.constant 0 : index
    %c0_3 = arith.constant 0 : index
    %10 = vector.load %arg1[%c1, %c0_2, %c0_3] : memref<3x24x128xf32, #tpu.memory_space<vmem>>, vector<1x24x128xf32>
    %11 = vector.shape_cast %10 : vector<1x24x128xf32> to vector<24x128xf32>
    %c2 = arith.constant 2 : index
    %c0_4 = arith.constant 0 : index
    %c0_5 = arith.constant 0 : index
    %12 = vector.load %arg1[%c2, %c0_4, %c0_5] : memref<3x24x128xf32, #tpu.memory_space<vmem>>, vector<1x24x128xf32>
    %13 = vector.shape_cast %12 : vector<1x24x128xf32> to vector<24x128xf32>
    %14 = arith.mulf %9, %9 : vector<24x128xf32>
    %15 = arith.mulf %11, %11 : vector<24x128xf32>
    %16 = arith.addf %14, %15 : vector<24x128xf32>
    %17 = arith.mulf %13, %13 : vector<24x128xf32>
    %18 = arith.addf %16, %17 : vector<24x128xf32>
    %cst = arith.constant 9.99999993E-9 : f32
    %19 = vector.broadcast %cst : f32 to vector<24x128xf32>
    %20 = arith.addf %18, %19 : vector<24x128xf32>
    %21 = math.rsqrt %20 : vector<24x128xf32>
    %22 = arith.mulf %20, %21 : vector<24x128xf32>
    %23 = arith.mulf %9, %21 : vector<24x128xf32>
    %24 = arith.mulf %11, %21 : vector<24x128xf32>
    %25 = arith.mulf %13, %21 : vector<24x128xf32>
    %26 = math.cos %22 : vector<24x128xf32>
    %27 = math.sin %22 : vector<24x128xf32>
    %cst_6 = arith.constant 1.000000e+00 : f32
    %28 = vector.broadcast %cst_6 : f32 to vector<24x128xf32>
    %29 = arith.subf %28, %26 : vector<24x128xf32>
    %30 = arith.mulf %29, %23 : vector<24x128xf32>
    %31 = arith.mulf %30, %23 : vector<24x128xf32>
    %32 = arith.addf %31, %26 : vector<24x128xf32>
    %33 = arith.mulf %29, %23 : vector<24x128xf32>
    %34 = arith.mulf %33, %24 : vector<24x128xf32>
    %35 = arith.mulf %27, %25 : vector<24x128xf32>
    %36 = arith.subf %34, %35 : vector<24x128xf32>
    %37 = arith.mulf %29, %23 : vector<24x128xf32>
    %38 = arith.mulf %37, %25 : vector<24x128xf32>
    %39 = arith.mulf %27, %24 : vector<24x128xf32>
    %40 = arith.addf %38, %39 : vector<24x128xf32>
    %41 = arith.mulf %29, %23 : vector<24x128xf32>
    %42 = arith.mulf %41, %24 : vector<24x128xf32>
    %43 = arith.mulf %27, %25 : vector<24x128xf32>
    %44 = arith.addf %42, %43 : vector<24x128xf32>
    %45 = arith.mulf %29, %24 : vector<24x128xf32>
    %46 = arith.mulf %45, %24 : vector<24x128xf32>
    %47 = arith.addf %46, %26 : vector<24x128xf32>
    %48 = arith.mulf %29, %24 : vector<24x128xf32>
    %49 = arith.mulf %48, %25 : vector<24x128xf32>
    %50 = arith.mulf %27, %23 : vector<24x128xf32>
    %51 = arith.subf %49, %50 : vector<24x128xf32>
    %52 = arith.mulf %29, %23 : vector<24x128xf32>
    %53 = arith.mulf %52, %25 : vector<24x128xf32>
    %54 = arith.mulf %27, %24 : vector<24x128xf32>
    %55 = arith.subf %53, %54 : vector<24x128xf32>
    %56 = arith.mulf %29, %24 : vector<24x128xf32>
    %57 = arith.mulf %56, %25 : vector<24x128xf32>
    %58 = arith.mulf %27, %23 : vector<24x128xf32>
    %59 = arith.addf %57, %58 : vector<24x128xf32>
    %60 = arith.mulf %29, %25 : vector<24x128xf32>
    %61 = arith.mulf %60, %25 : vector<24x128xf32>
    %62 = arith.addf %61, %26 : vector<24x128xf32>
    %c0_7 = arith.constant 0 : index
    %c0_8 = arith.constant 0 : index
    %63 = vector.load %arg7[%c0_7, %c0_8] : memref<216x128xf32, #tpu.memory_space<vmem>>, vector<24x128xf32>
    tpu.vector_store %arg7[%c0_7, %c0_8], %32 {strides = array<i32>} : memref<216x128xf32, #tpu.memory_space<vmem>>, vector<24x128xf32>,
    %c24 = arith.constant 24 : index
    %c0_9 = arith.constant 0 : index
    %64 = vector.load %arg7[%c24, %c0_9] : memref<216x128xf32, #tpu.memory_space<vmem>>, vector<24x128xf32>
    tpu.vector_store %arg7[%c24, %c0_9], %36 {strides = array<i32>} : memref<216x128xf32, #tpu.memory_space<vmem>>, vector<24x128xf32>,
    %c48 = arith.constant 48 : index
    %c0_10 = arith.constant 0 : index
    %65 = vector.load %arg7[%c48, %c0_10] : memref<216x128xf32, #tpu.memory_space<vmem>>, vector<24x128xf32>
    tpu.vector_store %arg7[%c48, %c0_10], %40 {strides = array<i32>} : memref<216x128xf32, #tpu.memory_space<vmem>>, vector<24x128xf32>,
    %c72 = arith.constant 72 : index
    %c0_11 = arith.constant 0 : index
    %66 = vector.load %arg7[%c72, %c0_11] : memref<216x128xf32, #tpu.memory_space<vmem>>, vector<24x128xf32>
    tpu.vector_store %arg7[%c72, %c0_11], %44 {strides = array<i32>} : memref<216x128xf32, #tpu.memory_space<vmem>>, vector<24x128xf32>,
    %c96 = arith.constant 96 : index
    %c0_12 = arith.constant 0 : index
    %67 = vector.load %arg7[%c96, %c0_12] : memref<216x128xf32, #tpu.memory_space<vmem>>, vector<24x128xf32>
    tpu.vector_store %arg7[%c96, %c0_12], %47 {strides = array<i32>} : memref<216x128xf32, #tpu.memory_space<vmem>>, vector<24x128xf32>,
    %c120 = arith.constant 120 : index
    %c0_13 = arith.constant 0 : index
    %68 = vector.load %arg7[%c120, %c0_13] : memref<216x128xf32, #tpu.memory_space<vmem>>, vector<24x128xf32>
    tpu.vector_store %arg7[%c120, %c0_13], %51 {strides = array<i32>} : memref<216x128xf32, #tpu.memory_space<vmem>>, vector<24x128xf32>,
    %c144 = arith.constant 144 : index
    %c0_14 = arith.constant 0 : index
    %69 = vector.load %arg7[%c144, %c0_14] : memref<216x128xf32, #tpu.memory_space<vmem>>, vector<24x128xf32>
    tpu.vector_store %arg7[%c144, %c0_14], %55 {strides = array<i32>} : memref<216x128xf32, #tpu.memory_space<vmem>>, vector<24x128xf32>,
    %c168 = arith.constant 168 : index
    %c0_15 = arith.constant 0 : index
    %70 = vector.load %arg7[%c168, %c0_15] : memref<216x128xf32, #tpu.memory_space<vmem>>, vector<24x128xf32>
    tpu.vector_store %arg7[%c168, %c0_15], %59 {strides = array<i32>} : memref<216x128xf32, #tpu.memory_space<vmem>>, vector<24x128xf32>,
    %c192 = arith.constant 192 : index
    %c0_16 = arith.constant 0 : index
    %71 = vector.load %arg7[%c192, %c0_16] : memref<216x128xf32, #tpu.memory_space<vmem>>, vector<24x128xf32>
    tpu.vector_store %arg7[%c192, %c0_16], %62 {strides = array<i32>} : memref<216x128xf32, #tpu.memory_space<vmem>>, vector<24x128xf32>,
    %c0_17 = arith.constant 0 : index
    %c0_18 = arith.constant 0 : index
    %72 = vector.load %arg7[%c0_17, %c0_18] : memref<216x128xf32, #tpu.memory_space<vmem>>, vector<216x128xf32>
    %c0_19 = arith.constant 0 : index
    %c0_20 = arith.constant 0 : index
    %73 = vector.load %arg3[%c0_19, %c0_20] : memref<72x216xf32, #tpu.memory_space<vmem>>, vector<72x216xf32>
    %cst_21 = arith.constant dense<0.000000e+00> : vector<72x128xf32>
    %74 = tpu.matmul %73, %72, %cst_21 {dimension_numbers = #tpu.dot_dimension_numbers<[1], [0], [0], [1], [0, 0, 1, 1], [], []>} : vector<72x216xf32>, vector<216x128xf32>, vector<72x128xf32> -> vector<72x128xf32>
    %c0_22 = arith.constant 0 : index
    %c0_23 = arith.constant 0 : index
    %75 = vector.load %arg2[%c0_22, %c0_23] : memref<216x128xf32, #tpu.memory_space<vmem>>, vector<216x128xf32>
    %76 = arith.subf %75, %72 : vector<216x128xf32>
    %77 = arith.mulf %76, %76 : vector<216x128xf32>
    %78 = vector.broadcast %7 : vector<1x128xf32> to vector<216x128xf32>
    %79 = arith.mulf %77, %78 : vector<216x128xf32>
    %80 = vector.shape_cast %79 : vector<216x128xf32> to vector<1x216x128xf32>
    %cst_24 = arith.constant dense<0.000000e+00> : vector<1xf32>
    %81 = vector.multi_reduction <add>, %80, %cst_24 [1, 2] : vector<1x216x128xf32> to vector<1xf32>
    %82 = vector.shape_cast %81 : vector<1xf32> to vector<1x1x1xf32>
    %83 = vector.extract %82[0, 0, 0] : f32 from vector<1x1x1xf32>
    %c0_25 = arith.constant 0 : index
    %c0_26 = arith.constant 0 : index
    %84 = vector.load %arg3[%c0_25, %c0_26] : memref<72x216xf32, #tpu.memory_space<vmem>>, vector<72x216xf32>
    %cst_27 = arith.constant dense<0.000000e+00> : vector<72x128xf32>
    %85 = tpu.matmul %84, %75, %cst_27 {dimension_numbers = #tpu.dot_dimension_numbers<[1], [0], [0], [1], [0, 0, 1, 1], [], []>} : vector<72x216xf32>, vector<216x128xf32>, vector<72x128xf32> -> vector<72x128xf32>
    %86 = arith.subf %85, %74 : vector<72x128xf32>
    %87 = arith.mulf %86, %86 : vector<72x128xf32>
    %88 = vector.broadcast %7 : vector<1x128xf32> to vector<72x128xf32>
    %89 = arith.mulf %87, %88 : vector<72x128xf32>
    %90 = vector.shape_cast %89 : vector<72x128xf32> to vector<1x72x128xf32>
    %cst_28 = arith.constant dense<0.000000e+00> : vector<1xf32>
    %91 = vector.multi_reduction <add>, %90, %cst_28 [1, 2] : vector<1x72x128xf32> to vector<1xf32>
    %92 = vector.shape_cast %91 : vector<1xf32> to vector<1x1x1xf32>
    %93 = vector.extract %92[0, 0, 0] : f32 from vector<1x1x1xf32>
    %c0_29 = arith.constant 0 : index
    %c0_30 = arith.constant 0 : index
    %94 = vector.load %arg6[%c0_29, %c0_30] : memref<72x128xf32, #tpu.memory_space<vmem>>, vector<72x128xf32>
    tpu.vector_store %arg6[%c0_29, %c0_30], %85 {strides = array<i32>} : memref<72x128xf32, #tpu.memory_space<vmem>>, vector<72x128xf32>,
    %c0_31 = arith.constant 0 : index
    %c0_32 = arith.constant 0 : index
    %95 = vector.load %arg4[%c0_31, %c0_32] : memref<72x128xf32, #tpu.memory_space<vmem>>, vector<72x128xf32>
    %96 = arith.subf %95, %74 : vector<72x128xf32>
    %97 = arith.mulf %96, %96 : vector<72x128xf32>
    %98 = vector.broadcast %7 : vector<1x128xf32> to vector<72x128xf32>
    %99 = arith.mulf %97, %98 : vector<72x128xf32>
    %100 = vector.shape_cast %99 : vector<72x128xf32> to vector<1x72x128xf32>
    %cst_33 = arith.constant dense<0.000000e+00> : vector<1xf32>
    %101 = vector.multi_reduction <add>, %100, %cst_33 [1, 2] : vector<1x72x128xf32> to vector<1xf32>
    %102 = vector.shape_cast %101 : vector<1xf32> to vector<1x1x1xf32>
    %103 = vector.extract %102[0, 0, 0] : f32 from vector<1x1x1xf32>
    %c0_34 = arith.constant 0 : index
    %104 = arith.index_cast %arg0 : i32 to index
    %105 = memref.load %arg5[%c0_34, %104] : memref<3x1xf32, #tpu.memory_space<smem>>
    memref.store %83, %arg5[%c0_34, %104] : memref<3x1xf32, #tpu.memory_space<smem>>
    %c1_35 = arith.constant 1 : index
    %106 = arith.index_cast %arg0 : i32 to index
    %107 = memref.load %arg5[%c1_35, %106] : memref<3x1xf32, #tpu.memory_space<smem>>
    memref.store %93, %arg5[%c1_35, %106] : memref<3x1xf32, #tpu.memory_space<smem>>
    %c2_36 = arith.constant 2 : index
    %108 = arith.index_cast %arg0 : i32 to index
    %109 = memref.load %arg5[%c2_36, %108] : memref<3x1xf32, #tpu.memory_space<smem>>
    memref.store %103, %arg5[%c2_36, %108] : memref<3x1xf32, #tpu.memory_space<smem>>
    return
  }
  func.func @transform_0(%arg0: i32) -> (i32, i32, i32) {
    %c0_i32 = arith.constant 0 : i32
    %c0_i32_0 = arith.constant 0 : i32
    %c0_i32_1 = arith.constant 0 : i32
    return %c0_i32, %c0_i32_0, %arg0 : i32, i32, i32
  }
  func.func @transform_1(%arg0: i32) -> (i32, i32) {
    %c0_i32 = arith.constant 0 : i32
    %c0_i32_0 = arith.constant 0 : i32
    return %c0_i32, %arg0 : i32, i32
  }
  func.func @transform_2(%arg0: i32) -> (i32, i32) {
    %c0_i32 = arith.constant 0 : i32
    %c0_i32_0 = arith.constant 0 : i32
    %c0_i32_1 = arith.constant 0 : i32
    return %c0_i32, %c0_i32_0 : i32, i32
  }
  func.func @transform_3(%arg0: i32) -> (i32, i32) {
    %c0_i32 = arith.constant 0 : i32
    %c0_i32_0 = arith.constant 0 : i32
    return %c0_i32, %arg0 : i32, i32
  }
  func.func @transform_4(%arg0: i32) -> (i32, i32) {
    %c0_i32 = arith.constant 0 : i32
    %c0_i32_0 = arith.constant 0 : i32
    %c0_i32_1 = arith.constant 0 : i32
    return %c0_i32, %c0_i32_0 : i32, i32
  }
  func.func @transform_5(%arg0: i32) -> (i32, i32) {
    %c0_i32 = arith.constant 0 : i32
    %c0_i32_0 = arith.constant 0 : i32
    return %c0_i32, %arg0 : i32, i32
  }
}

</mosaic_0001>

<bundles_post_ra>
// kernel: tpu_custom_call.1
= control target key start
LH: loop header
LB: loop body
LE: loop exit
PB: predicated region body
PF: predicated region fallthrough
CT: control target
= control target key end

     0   :  { %11 = vsyncpa [#allocation4], 0  ;;  %s2809_s0 = inlined_call_operand.hbm [shape: f32[3,24,128], index: 0, kind: input, shape index: {}]   ;;  %s2810_s1 = inlined_call_operand.hbm [shape: f32[216,128], index: 1, kind: input, shape index: {}]   ;;  %s2811_s2 = inlined_call_operand.hbm [shape: f32[72,216], index: 2, kind: input, shape index: {}]   ;;  %s2812_s3 = inlined_call_operand.hbm [shape: f32[72,128], index: 3, kind: input, shape index: {}]   ;;  %s2813_s4 = inlined_call_operand.vmem [shape: f32[3,1], index: 4, kind: output, shape index: {0}]   ;;  %s2814_s5 = inlined_call_operand.hbm [shape: f32[72,128], index: 5, kind: output, shape index: {1}]  }
   0x1   :  { %12 = vsyncpa [#allocation8], 0 }
   0x2   :  { %13 = vsyncpa [#allocation11], 0 }
   0x3   :  { %14 = vsyncpa [#allocation6], 0 }
   0x4   :  { %15 = vsyncpa [#allocation5], 0  ;;  %s33_s20 = sshll.u32 %s2810_s1, 4  ;;  %s1944_s21 = smov [#allocation7]   ;;  %s34_s20 = int_to_ptr.hbm [resolvable:$true] %s33_s20 }
   0x5   :  { %s35_s22 = sshll.u32 %s1944_s21, 4  ;;  %s20_s25 = sshll.u32 %s2809_s0, 4  ;;  %s36_s22 = int_to_ptr.vmem [resolvable:$true] %s35_s22  ;;  %s21_s25 = int_to_ptr.hbm [resolvable:$true] %s20_s25 }
   0x6   :  { %s1945_s26 = smov 128   ;;  %s1946_s27 = smov 8  }
   0x7   :  { %41 = dma.hbm_to_vmem [thread:$0]  %s34_s20, 3456, %s36_s22, [#allocation8], %s1945_s26, %s1945_s26, %s1946_s27  }
   0x8   :  { %s1947_s28 = smov [#allocation3]   ;;  %s46_s1 = sshll.u32 %s2811_s2, 4  ;;  %s47_s1 = int_to_ptr.hbm [resolvable:$true] %s46_s1 }
   0x9   :  { %s22_s29 = sshll.u32 %s1947_s28, 4  ;;  %s1948_s0 = smov [#allocation9]   ;;  %s23_s29 = int_to_ptr.vmem [resolvable:$true] %s22_s29 }
   0xa   :  { %28 = dma.hbm_to_vmem [thread:$0]  %s21_s25, 1152, %s23_s29, [#allocation4], %s1945_s26, %s1945_s26, %s1946_s27  }
   0xb   :  { %s48_s7 = sshll.u32 %s1948_s0, 4  ;;  %s59_s10 = sshll.u32 %s2812_s3, 4  ;;  %s49_s7 = int_to_ptr.vmem [resolvable:$true] %s48_s7  ;;  %s60_s10 = int_to_ptr.hbm [resolvable:$true] %s59_s10 }
   0xc   :  { %s1949_s11 = smov 256   ;;  %s1950_s12 = smov 16  }
   0xd   :  { %54 = dma.hbm_to_vmem [thread:$0]  %s47_s1, 2304, %s49_s7, [#allocation8], %s1949_s11, %s1949_s11, %s1950_s12  }
   0xe   :  { %s1951_s13 = smov [#allocation10]  }
   0xf   :  { %s61_s14 = sshll.u32 %s1951_s13, 4  ;;  %s62_s14 = int_to_ptr.vmem [resolvable:$true] %s61_s14 }
  0x10   :  { %67 = dma.hbm_to_vmem [thread:$0]  %s60_s10, 1152, %s62_s14, [#allocation11], %s1945_s26, %s1945_s26, %s1946_s27  }
  0x11   :  { %1934 = dma.done.wait [#allocation4], 1152  }
  0x12   :  { %1935 = vsyncadd [#allocation4], 4294966144 }
  0x13   :  { %1936 = dma.done.wait [#allocation8], 5760  }
  0x14   :  { %1937 = vsyncadd [#allocation8], 4294961536 }
  0x15   :  { %1938 = dma.done.wait [#allocation11], 1152  }
  0x16   :  { %1939 = vsyncadd [#allocation11], 4294966144  ;;  %v92_v0 = vld [vmem:[#allocation3] sm:$0xff]  ;;  %v96_v1 = vld [vmem:[#allocation3 + $0x18] sm:$0xff]  ;;  %s1960_s2 = smov [#allocation13]   ;;  %s1708_s17 = sshll.u32 %s2814_s5, 4  ;;  %s1709_s17 = int_to_ptr.hbm [resolvable:$true] %s1708_s17 }
  0x17   :  { %v100_v2 = vld [vmem:[#allocation3 + $0x30] sm:$0xff]  ;;  %v103_v3 = vmul.f32 %v92_v0, %v92_v0  ;;  %v106_v4 = vmul.f32 %v96_v1, %v96_v1  ;;  %v2015_v7 = vld [vmem:[#allocation3 + $0x28] sm:$0xff]  ;;  %v102_v8 = vld [vmem:[#allocation3 + $0x40] sm:$0xff]  ;;  %s1706_s3 = sshll.u32 %s1960_s2, 4  ;;  %s1698_s20 = sshll.u32 %s2813_s4, 4  ;;  %s1707_s3 = int_to_ptr.vmem [resolvable:$true] %s1706_s3  ;;  %s1699_s20 = int_to_ptr.vmem [resolvable:$true] %s1698_s20 }
  0x18   :  { %v112_v5 = vmul.f32 %v100_v2, %v100_v2  ;;  %v2013_v6 = vld [vmem:[#allocation3 + $0x10] sm:$0xff]  ;;  %v108_v10 = vmul.f32 %v2015_v7, %v2015_v7  ;;  %v114_v11 = vmul.f32 %v102_v8, %v102_v8  ;;  %v93_v12 = vld [vmem:[#allocation3 + $0x8] sm:$0xff]  ;;  %v97_v13 = vld [vmem:[#allocation3 + $0x20] sm:$0xff]  ;;  %s1961_s23 = smov [#allocation12]  }
  0x19   :  { %v105_v9 = vmul.f32 %v2013_v6, %v2013_v6  ;;  %v101_v14 = vld [vmem:[#allocation3 + $0x38] sm:$0xff]  ;;  %v109_v15 = vadd.f32 %v106_v4, %v103_v3  ;;  %v104_v16 = vmul.f32 %v93_v12, %v93_v12  ;;  %v107_v17 = vmul.f32 %v97_v13, %v97_v13 }
  0x1a   :  { %v113_v18 = vmul.f32 %v101_v14, %v101_v14  ;;  %v1952_v13 = vmov 683565275  }
  0x1b   :  { %v111_v19 = vadd.f32 %v108_v10, %v105_v9  ;;  %v115_v20 = vadd.f32 %v112_v5, %v109_v15  ;;  %v110_v21 = vadd.f32 %v107_v17, %v104_v16  ;;  %v1953_v15 = vmov 2475754826  }
  0x1c   :  { %v1954_v17 = vmov 2131351028  }
  0x1d   :  { %v117_v22 = vadd.f32 %v114_v11, %v111_v19  ;;  %v118_v23 = vadd.f32 1e-08, %v115_v20  ;;  %v116_v24 = vadd.f32 %v113_v18, %v110_v21  ;;  %v1955_v19 = vmov 2102212464  }
  0x1e   :  { %v1956_v21 = vmov 920167782  }
  0x1f   :  { %v120_v25 = vadd.f32 1e-08, %v117_v22  ;;  %1792 = vrsqrt.f32 %v118_v23  ;;  %v119_v26 = vadd.f32 1e-08, %v116_v24  ;;  %vm127_vm0 = vweird.f32 %v118_v23 }
  0x21   :  { %1794 = vrsqrt.f32 %v120_v25  ;;  %vm147_vm2 = vweird.f32 %v120_v25  ;;  %vm137_vm5 = vweird.f32 %v119_v26 }
  0x22   :  { %1796 = vrsqrt.f32 %v119_v26 }
  0x25   :  { %v1793_v27 = vpop.eup %1792 }
  0x26   :  { %v122_v29 = vmul.f32 %v1793_v27, %v118_v23  ;;  %vm128_vm1 = vweird.f32 %v1793_v27 }
  0x27   :  { %v1795_v28 = vpop.eup %1794  ;;  %vm129_vm4 = vmor %vm127_vm0, %vm128_vm1 }
  0x28   :  { %v1797_v30 = vpop.eup %1796  ;;  %v142_v31 = vmul.f32 %v1795_v28, %v120_v25  ;;  %v123_v32 = vmul.f32 %v1793_v27, %v122_v29  ;;  %vm148_vm3 = vweird.f32 %v1795_v28 }
  0x29   :  { %v132_v33 = vmul.f32 %v1797_v30, %v119_v26  ;;  %vm138_vm6 = vweird.f32 %v1797_v30  ;;  %vm149_vm7 = vmor %vm147_vm2, %vm148_vm3 }
  0x2a   :  { %v143_v34 = vmul.f32 %v1795_v28, %v142_v31  ;;  %v124_v35 = vmul.f32 0.5, %v123_v32  ;;  %vm139_vm8 = vmor %vm137_vm5, %vm138_vm6 }
  0x2b   :  { %v133_v36 = vmul.f32 %v1797_v30, %v132_v33 }
  0x2c   :  { %v144_v37 = vmul.f32 0.5, %v143_v34  ;;  %v125_v38 = vsub.f32 1.5, %v124_v35 }
  0x2d   :  { %v134_v39 = vmul.f32 0.5, %v133_v36 }
  0x2e   :  { %v145_v40 = vsub.f32 1.5, %v144_v37  ;;  %v126_v41 = vmul.f32 %v1793_v27, %v125_v38 }
  0x2f   :  { %v135_v42 = vsub.f32 1.5, %v134_v39 }
  0x30   :  { %v146_v43 = vmul.f32 %v1795_v28, %v145_v40  ;;  %v130_v44 = vsel %vm129_vm4, %v1793_v27, %v126_v41 }
  0x31   :  { %v136_v45 = vmul.f32 %v1797_v30, %v135_v42  ;;  %v2021_v46 = vmul.f32 %v130_v44, %v118_v23  ;;  %v2023_v47 = vmul.f32 %v130_v44, %v92_v0  ;;  %v2025_v48 = vmul.f32 %v130_v44, %v96_v1 }
  0x32   :  { %v2027_v49 = vmul.f32 %v130_v44, %v100_v2  ;;  %v2029_v50 = vsel %vm149_vm7, %v1795_v28, %v146_v43 }
  0x33   :  { %v163_v51 = vand.u32 2147483647, %v2021_v46  ;;  %v166_v52 = vand.u32 2139095040, %v2021_v46  ;;  %v2034_v53 = vmul.f32 %v2029_v50, %v120_v25  ;;  %v2036_v54 = vsel %vm139_vm8, %v1797_v30, %v136_v45 }
  0x34   :  { %v2043_v59 = vmul.f32 %v2036_v54, %v119_v26  ;;  %v1957_v30 = vmov 1326507024  }
  0x35   :  { %v167_v55 = vshrl.u32 %v166_v52, 23  ;;  %v170_v56 = vand.u32 8388607, %v163_v51  ;;  %v474_v57 = vand.u32 2139095040, %v2034_v53  ;;  %v471_v58 = vand.u32 2147483647, %v2034_v53 }
  0x36   :  { %v320_v2 = vand.u32 2139095040, %v2043_v59 }
  0x37   :  { %v1732_v60 = vadd.s32 4294967169, %v167_v55  ;;  %v475_v61 = vshrl.u32 %v474_v57, 23  ;;  %v171_v62 = vor.u32 8388608, %v170_v56  ;;  %v478_v1 = vand.u32 8388607, %v471_v58 }
  0x38   :  { %v2050_v11 = vshrl.u32 %v320_v2, 23 }
  0x39   :  { %v173_v63 = vadd.s32 1, %v1732_v60  ;;  %v1738_v0 = vadd.s32 4294967169, %v475_v61  ;;  %v2048_v5 = vshll.u32 %v171_v62, 8  ;;  %v479_v10 = vor.u32 8388608, %v478_v1 }
  0x3b   :  { %vm174_vm9 = vcmp.gt.s32.totalorder %v173_v63, 0  ;;  %v481_v3 = vadd.s32 1, %v1738_v0  ;;  %v212_v23 = vand.u32 65535, %v2048_v5  ;;  %v213_v56 = vshrl.u32 %v2048_v5, 16 }
  0x3c   :  { %v175_v4 = vsel %vm174_vm9, %v173_v63, 0  ;;  %v2071_v57 = vshll.u32 %v479_v10, 8 }
  0x3d   :  { %v177_v8 = vand.u32 31, %v175_v4  ;;  %vm482_vm10 = vcmp.gt.s32.totalorder %v481_v3, 0  ;;  %v176_v9 = vshrl.u32 %v175_v4, 5 }
  0x3e   :  { %v483_v24 = vsel %vm482_vm10, %v481_v3, 0 }
  0x3f   :  { %v178_v12 = vsub.s32 32, %v177_v8  ;;  %v180_v14 = vshll.u32 %v1952_v13, %v177_v8  ;;  %v183_v16 = vshll.u32 %v1953_v15, %v177_v8  ;;  %v186_v18 = vshll.u32 %v1954_v17, %v177_v8 }
  0x40   :  { %v189_v20 = vshll.u32 %v1955_v19, %v177_v8  ;;  %v192_v22 = vshll.u32 %v1956_v21, %v177_v8  ;;  %vm195_vm11 = vcmp.lt.s32.totalorder %v176_v9, 1  ;;  %vm196_vm12 = vcmp.lt.s32.totalorder %v176_v9, 2 }
  0x41   :  { %v179_v25 = vshrl.u32 %v1952_v13, %v178_v12  ;;  %v181_v26 = vshrl.u32 %v1953_v15, %v178_v12  ;;  %v184_v27 = vshrl.u32 %v1954_v17, %v178_v12  ;;  %v187_v28 = vshrl.u32 %v1955_v19, %v178_v12 }
  0x42   :  { %v190_v29 = vshrl.u32 %v1956_v21, %v178_v12  ;;  %v193_v31 = vshrl.u32 %v1957_v30, %v178_v12  ;;  %vm198_vm13 = vcmp.lt.s32.totalorder %v176_v9, 4  ;;  %vm197_vm14 = vcmp.lt.s32.totalorder %v176_v9, 3 }
  0x43   :  { %v182_v32 = vor.u32 %v181_v26, %v180_v14  ;;  %v185_v33 = vor.u32 %v184_v27, %v183_v16  ;;  %v188_v34 = vor.u32 %v187_v28, %v186_v18  ;;  %v2065_v37 = vand.u32 31, %v483_v24 }
  0x44   :  { %v191_v35 = vor.u32 %v190_v29, %v189_v20  ;;  %v194_v36 = vor.u32 %v193_v31, %v192_v22  ;;  %v2078_v63 = vshrl.u32 %v483_v24, 5 }
  0x45   :  { %v199_v38 = vsel %vm195_vm11, %v179_v25, %v182_v32  ;;  %v200_v39 = vsel %vm198_vm13, %v188_v34, 2102212464  ;;  %v203_v40 = vsel %vm195_vm11, %v182_v32, %v185_v33  ;;  %v207_v41 = vsel %vm195_vm11, %v185_v33, %v188_v34 }
  0x46   :  { %v201_v42 = vsel %vm197_vm14, %v185_v33, %v200_v39  ;;  %v204_v43 = vsel %vm198_vm13, %v191_v35, 920167782  ;;  %v208_v44 = vsel %vm198_vm13, %v194_v36, 1326507024  ;;  %v2068_v45 = vsub.s32 32, %v2065_v37 }
  0x47   :  { %v205_v52 = vsel %vm197_vm14, %v188_v34, %v204_v43  ;;  %v209_v55 = vsel %vm197_vm14, %v191_v35, %v208_v44  ;;  %v2074_v60 = vsel %vm196_vm12, %v199_v38, %v201_v42  ;;  %v488_v4 = vshll.u32 %v1952_v13, %v2065_v37 }
  0x48   :  { %v206_v61 = vsel %vm196_vm12, %v203_v40, %v205_v52  ;;  %v210_v62 = vsel %vm196_vm12, %v207_v41, %v209_v55  ;;  %v489_v8 = vshrl.u32 %v1953_v15, %v2068_v45  ;;  %v491_v10 = vshll.u32 %v1953_v15, %v2065_v37 }
  0x49   :  { %v214_v0 = vand.u32 65535, %v210_v62  ;;  %v215_v1 = vshrl.u32 %v210_v62, 16  ;;  %v236_v2 = vand.u32 65535, %v206_v61  ;;  %v237_v3 = vshrl.u32 %v206_v61, 16 }
  0x4a   :  { %v492_v12 = vshrl.u32 %v1954_v17, %v2068_v45  ;;  %v494_v18 = vshll.u32 %v1954_v17, %v2065_v37  ;;  %v2090_v38 = vor.u32 %v489_v8, %v488_v4  ;;  %v1958_v39 = vmov 0  }
  0x4b   :  { %v216_v9 = vmul.u32 %v214_v0, %v212_v23  ;;  %v217_v14 = vmul.u32 %v215_v1, %v212_v23  ;;  %v218_v16 = vmul.u32 %v214_v0, %v213_v56  ;;  %v219_v20 = vmul.u32 %v215_v1, %v213_v56 }
  0x4c   :  { %v238_v22 = vmul.u32 %v236_v2, %v212_v23  ;;  %v239_v24 = vmul.u32 %v237_v3, %v212_v23  ;;  %v240_v25 = vmul.u32 %v236_v2, %v213_v56  ;;  %v241_v29 = vmul.u32 %v237_v3, %v213_v56 }
  0x4d   :  { %v220_v26 = vshll.u32 %v217_v14, 16  ;;  %v221_v27 = vshrl.u32 %v217_v14, 16  ;;  %v222_v28 = vshll.u32 %v218_v16, 16  ;;  %v223_v31 = vshrl.u32 %v218_v16, 16 }
  0x4e   :  { %v242_v32 = vshll.u32 %v239_v24, 16  ;;  %v243_v33 = vshrl.u32 %v239_v24, 16  ;;  %v244_v34 = vshll.u32 %v240_v25, 16  ;;  %v245_v36 = vshrl.u32 %v240_v25, 16 }
  0x4f   :  { %vm224_vm15 = vc.u32 %v216_v9, %v220_v26  ;;  %v226_v35 = vadd.s32 %v220_v26, %v216_v9  ;;  %v495_v23 = vshrl.u32 %v1955_v19, %v2068_v45  ;;  %v497_v44 = vshll.u32 %v1955_v19, %v2065_v37 }
  0x50   :  { %v225_v40 = vsel %vm224_vm15, 1, %v1958_v39  ;;  %vm246_vm0 = vc.u32 %v238_v22, %v242_v32  ;;  %v248_v41 = vadd.s32 %v242_v32, %v238_v22  ;;  %v493_v56 = vor.u32 %v492_v12, %v491_v10 }
  0x51   :  { %v227_v42 = vadd.s32 %v225_v40, %v219_v20  ;;  %vm228_vm1 = vc.u32 %v226_v35, %v222_v28  ;;  %v247_v43 = vsel %vm246_vm0, 1, %v1958_v39  ;;  %v496_v0 = vor.u32 %v495_v23, %v494_v18 }
  0x52   :  { %v229_v52 = vsel %vm228_vm1, 1, %v1958_v39  ;;  %v249_v55 = vadd.s32 %v247_v43, %v241_v29  ;;  %vm250_vm2 = vc.u32 %v248_v41, %v244_v34  ;;  %v498_v1 = vshrl.u32 %v1956_v21, %v2068_v45 }
  0x53   :  { %v231_v61 = vadd.s32 %v229_v52, %v227_v42  ;;  %v251_v62 = vsel %vm250_vm2, 1, %v1958_v39  ;;  %v500_v3 = vshll.u32 %v1956_v21, %v2065_v37  ;;  %v501_v4 = vshrl.u32 %v1957_v30, %v2068_v45 }
  0x54   :  { %v253_v2 = vadd.s32 %v251_v62, %v249_v55  ;;  %vm503_vm3 = vcmp.lt.s32.totalorder %v2078_v63, 1  ;;  %v2107_v9 = vadd.s32 %v248_v41, %v244_v34  ;;  %v499_v10 = vor.u32 %v498_v1, %v497_v44 }
  0x55   :  { %v232_v8 = vadd.s32 %v231_v61, %v221_v27  ;;  %vm505_vm4 = vcmp.lt.s32.totalorder %v2078_v63, 3  ;;  %v502_v14 = vor.u32 %v501_v4, %v500_v3  ;;  %vm504_vm5 = vcmp.lt.s32.totalorder %v2078_v63, 2 }
  0x56   :  { %v254_v12 = vadd.s32 %v253_v2, %v243_v33  ;;  %vm506_vm6 = vcmp.lt.s32.totalorder %v2078_v63, 4  ;;  %v511_v37 = vsel %vm503_vm3, %v2090_v38, %v493_v56  ;;  %v1735_v20 = vadd.s32 4294967169, %v2050_v11 }
  0x57   :  { %v2112_v16 = vadd.s32 %v232_v8, %v223_v31  ;;  %v512_v18 = vsel %vm506_vm6, %v499_v10, 920167782  ;;  %v520_v25 = vand.u32 65535, %v2071_v57  ;;  %v521_v26 = vshrl.u32 %v2071_v57, 16 }
  0x58   :  { %v255_v22 = vadd.s32 %v254_v12, %v245_v36  ;;  %v513_v24 = vsel %vm505_vm4, %v496_v0, %v512_v18  ;;  %v256_v27 = vmul.u32 %v2048_v5, %v2074_v60  ;;  %v515_v11 = vsel %vm503_vm3, %v493_v56, %v496_v0 }
  0x59   :  { %vm258_vm7 = vc.u32 %v2112_v16, %v2107_v9  ;;  %v514_v28 = vsel %vm504_vm5, %v511_v37, %v513_v24  ;;  %v516_v31 = vsel %vm506_vm6, %v502_v14, 1326507024  ;;  %v327_v35 = vadd.s32 1, %v1735_v20 }
  0x5a   :  { %v259_v29 = vadd.s32 1, %v255_v22  ;;  %v544_v32 = vand.u32 65535, %v514_v28  ;;  %v545_v33 = vshrl.u32 %v514_v28, 16  ;;  %v517_v34 = vsel %vm505_vm4, %v499_v10, %v516_v31 }
  0x5b   :  { %v487_v60 = vshrl.u32 %v1952_v13, %v2068_v45  ;;  %v518_v36 = vsel %vm504_vm5, %v515_v11, %v517_v34  ;;  %v508_v44 = vsel %vm506_vm6, %v496_v0, 2102212464  ;;  %v317_v2 = vand.u32 2147483647, %v2043_v59 }
  0x5c   :  { %v260_v5 = vsel %vm258_vm7, %v259_v29, %v255_v22  ;;  %v547_v40 = vmul.u32 %v545_v33, %v520_v25  ;;  %v522_v23 = vand.u32 65535, %v518_v36  ;;  %v523_v42 = vshrl.u32 %v518_v36, 16 }
  0x5d   :  { %v261_v41 = vadd.s32 %v260_v5, %v256_v27  ;;  %v548_v43 = vmul.u32 %v544_v32, %v521_v26  ;;  %v546_v52 = vmul.u32 %v544_v32, %v520_v25  ;;  %v507_v45 = vsel %vm503_vm3, %v487_v60, %v2090_v38 }
  0x5e   :  { %v550_v55 = vshll.u32 %v547_v40, 16  ;;  %v524_v62 = vmul.u32 %v522_v23, %v520_v25  ;;  %v525_v1 = vmul.u32 %v523_v42, %v520_v25  ;;  %v526_v3 = vmul.u32 %v522_v23, %v521_v26 }
  0x5f   :  { %v262_v61 = vadd.s32 536870912, %v261_v41  ;;  %v552_v4 = vshll.u32 %v548_v43, 16  ;;  %vm328_vm8 = vcmp.gt.s32.totalorder %v327_v35, 0  ;;  %v509_v10 = vsel %vm505_vm4, %v493_v56, %v508_v44 }
  0x60   :  { %v527_v0 = vmul.u32 %v523_v42, %v521_v26  ;;  %v528_v12 = vshll.u32 %v525_v1, 16  ;;  %v530_v14 = vshll.u32 %v526_v3, 16  ;;  %v549_v37 = vmul.u32 %v545_v33, %v521_v26 }
  0x61   :  { %v2146_v8 = vshrl.u32 %v262_v61, 30  ;;  %vm554_vm9 = vc.u32 %v546_v52, %v550_v55  ;;  %v556_v18 = vadd.s32 %v550_v55, %v546_v52  ;;  %v329_v24 = vsel %vm328_vm8, %v327_v35, 0 }
  0x62   :  { %vm532_vm10 = vc.u32 %v524_v62, %v528_v12  ;;  %v534_v22 = vadd.s32 %v528_v12, %v524_v62  ;;  %v551_v25 = vshrl.u32 %v547_v40, 16  ;;  %v555_v27 = vsel %vm554_vm9, 1, %v1958_v39 }
  0x63   :  { %v264_v20 = vshll.u32 %v2146_v8, 30  ;;  %v533_v38 = vsel %vm532_vm10, 1, %v1958_v39  ;;  %vm558_vm11 = vc.u32 %v556_v18, %v552_v4  ;;  %v529_v11 = vshrl.u32 %v525_v1, 16 }
  0x64   :  { %v535_v56 = vadd.s32 %v533_v38, %v527_v0  ;;  %vm536_vm12 = vc.u32 %v534_v22, %v530_v14  ;;  %v531_v29 = vshrl.u32 %v526_v3, 16  ;;  %v557_v31 = vadd.s32 %v555_v27, %v549_v37 }
  0x65   :  { %v265_v28 = vsub.s32 %v261_v41, %v264_v20  ;;  %v537_v26 = vsel %vm536_vm12, 1, %v1958_v39  ;;  %v559_v32 = vsel %vm558_vm11, 1, %v1958_v39  ;;  %v331_v35 = vand.u32 31, %v329_v24 }
  0x66   :  { %v539_v34 = vadd.s32 %v537_v26, %v535_v56  ;;  %v553_v5 = vshrl.u32 %v548_v43, 16  ;;  %v561_v60 = vadd.s32 %v559_v32, %v557_v31  ;;  %v510_v40 = vsel %vm504_vm5, %v507_v45, %v509_v10 }
  0x67   :  { %vm266_vm13 = vcmp.lt.s32.totalorder %v265_v28, 0  ;;  %v267_v33 = vsub.s32 0, %v265_v28  ;;  %v2157_v23 = vsub.s32 32, %v331_v35  ;;  %v2159_v44 = vadd.s32 %v556_v18, %v552_v4 }
  0x68   :  { %v540_v41 = vadd.s32 %v539_v34, %v529_v11  ;;  %v562_v52 = vadd.s32 %v561_v60, %v551_v25  ;;  %v324_v61 = vand.u32 8388607, %v317_v2  ;;  %v257_v43 = vadd.s32 %v2107_v9, %v2112_v16 }
  0x69   :  { %v268_v36 = vsel %vm266_vm13, %v267_v33, %v265_v28  ;;  %v564_v63 = vmul.u32 %v2071_v57, %v510_v40  ;;  %v334_v45 = vshll.u32 %v1952_v13, %v331_v35  ;;  %v335_v3 = vshrl.u32 %v1953_v15, %v2157_v23 }
  0x6a   :  { %v269_v42 = vclz %v268_v36  ;;  %v2161_v55 = vadd.s32 %v540_v41, %v531_v29  ;;  %v563_v1 = vadd.s32 %v562_v52, %v553_v5  ;;  %v337_v4 = vshll.u32 %v1953_v15, %v331_v35 }
  0x6b   :  { %v340_v10 = vshll.u32 %v1954_v17, %v331_v35  ;;  %v338_v9 = vshrl.u32 %v1954_v17, %v2157_v23  ;;  %v341_v57 = vshrl.u32 %v1955_v19, %v2157_v23  ;;  %v343_v12 = vshll.u32 %v1955_v19, %v331_v35 }
  0x6c   :  { %v1733_v62 = vadd.s32 4294967294, %v269_v42  ;;  %vm566_vm15 = vc.u32 %v2161_v55, %v2159_v44  ;;  %v567_v0 = vadd.s32 1, %v563_v1  ;;  %v344_v14 = vshrl.u32 %v1956_v21, %v2157_v23 }
  0x6d   :  { %v2182_v20 = vshrl.u32 %v329_v24, 5  ;;  %v287_v22 = vsub.s32 4, %v2146_v8  ;;  %v325_v25 = vor.u32 8388608, %v324_v61  ;;  %v2185_v27 = vor.u32 %v335_v3, %v334_v45 }
  0x6e   :  { %vm1734_vm14 = vcmp.lt.s32.totalorder %v1733_v62, 0  ;;  %v568_v38 = vsel %vm566_vm15, %v567_v0, %v563_v1  ;;  %v346_v29 = vshll.u32 %v1956_v21, %v331_v35  ;;  %v2188_v19 = vor.u32 %v338_v9, %v337_v4  ;;  %v2196_v35 = vld [vmem:[#allocation7 + $0x78] sm:$0xff] }
  0x6f   :  { %v272_v16 = vsel %vm1734_vm14, 0, %v1733_v62  ;;  %v569_v56 = vadd.s32 %v568_v38, %v564_v63  ;;  %v342_v26 = vor.u32 %v341_v57, %v340_v10  ;;  %v345_v31 = vor.u32 %v344_v14, %v343_v12  ;;  %1487 = vmatpush.msra.mxu2 %v2196_v35 }
  0x70   :  { %v273_v15 = vsub.s32 32, %v272_v16  ;;  %v274_v37 = vshll.u32 %v265_v28, %v272_v16  ;;  %v277_v18 = vsub.s32 4294967266, %v272_v16  ;;  %v347_v28 = vshrl.u32 %v1957_v30, %v2157_v23 }
  0x71   :  { %v570_v33 = vadd.s32 536870912, %v569_v56  ;;  %vm352_vm0 = vcmp.lt.s32.totalorder %v2182_v20, 4  ;;  %vm165_vm1 = vcmp.lt.s32.totalorder %v2021_v46, 0  ;;  %vm349_vm2 = vcmp.lt.s32.totalorder %v2182_v20, 1 }
  0x72   :  { %v275_v17 = vshrl.u32 %v257_v43, %v273_v15  ;;  %v278_v11 = vadd.s32 127, %v277_v18  ;;  %vm351_vm3 = vcmp.lt.s32.totalorder %v2182_v20, 3  ;;  %v348_v60 = vor.u32 %v347_v28, %v346_v29 }
  0x73   :  { %v2198_v5 = vshrl.u32 %v570_v33, 30  ;;  %v288_v30 = vsel %vm165_vm1, %v287_v22, %v2146_v8  ;;  %vm350_vm4 = vcmp.lt.s32.totalorder %v2182_v20, 2  ;;  %v358_v36 = vsel %vm352_vm0, %v345_v31, 920167782 }
  0x74   :  { %v276_v24 = vor.u32 %v275_v17, %v274_v37  ;;  %v279_v32 = vshll.u32 %v278_v11, 23  ;;  %v2207_v40 = vshll.u32 %v325_v25, 8  ;;  %v357_v52 = vsel %vm349_vm2, %v2185_v27, %v2188_v19 }
  0x75   :  { %v572_v42 = vshll.u32 %v2198_v5, 30  ;;  %v359_v8 = vsel %vm351_vm3, %v342_v26, %v358_v36  ;;  %vm2218_vm5 = vcmp.le.f32.partialorder %v163_v51, 0.7853982  ;;  %v361_v43 = vsel %vm349_vm2, %v2188_v19, %v342_v26 }
  0x76   :  { %v280_v34 = vor.u32 4788187, %v279_v32  ;;  %v283_v21 = vcvt.s32.f32 %v276_v24  ;;  %v362_v62 = vsel %vm352_vm0, %v348_v60, 1326507024  ;;  %v290_v63 = vsel %vm2218_vm5, 0, %v288_v30 }
  0x77   :  { %v2229_v45 = vsub.s32 %v569_v56, %v572_v42  ;;  %v363_v3 = vsel %vm351_vm3, %v345_v31, %v362_v62  ;;  %v2235_v51 = vsel %vm350_vm4, %v357_v52, %v359_v8  ;;  %v366_v10 = vand.u32 65535, %v2207_v40 }
  0x78   :  { %v281_v41 = vand.u32 2147483647, %v280_v34  ;;  %v364_v4 = vsel %vm350_vm4, %v361_v43, %v363_v3  ;;  %v367_v0 = vshrl.u32 %v2207_v40, 16  ;;  %v769_v12 = vadd.s32 3, %v290_v63 }
  0x79   :  { %vm574_vm6 = vcmp.lt.s32.totalorder %v2229_v45, 0  ;;  %v575_v16 = vsub.s32 0, %v2229_v45  ;;  %v368_v57 = vand.u32 65535, %v364_v4  ;;  %v369_v14 = vshrl.u32 %v364_v4, 16 }
  0x7a   :  { %v284_v1 = vmul.f32 %v283_v21, %v281_v41  ;;  %v333_v18 = vshrl.u32 %v1952_v13, %v2157_v23  ;;  %v391_v22 = vshrl.u32 %v2235_v51, 16  ;;  %v2258_v29 = vand.u32 3, %v290_v63 }
  0x7b   :  { %v576_v37 = vsel %vm574_vm6, %v575_v16, %v2229_v45  ;;  %v370_v17 = vmul.u32 %v368_v57, %v366_v10  ;;  %v2254_v11 = vmul.u32 %v369_v14, %v366_v10  ;;  %v565_v31 = vadd.s32 %v2159_v44, %v2161_v55 }
  0x7c   :  { %v285_v9 = vxor.u32 2147483648, %v284_v1  ;;  %v577_v25 = vclz %v576_v37  ;;  %v2262_v13 = vmul.u32 %v368_v57, %v367_v0  ;;  %v2264_v23 = vand.u32 3, %v769_v12 }
  0x7d   :  { %v354_v24 = vsel %vm352_vm0, %v342_v26, 2102212464  ;;  %v374_v32 = vshll.u32 %v2254_v11, 16  ;;  %v2272_v21 = vsel %vm349_vm2, %v333_v18, %v2185_v27  ;;  %v390_v60 = vand.u32 65535, %v2235_v51 }
  0x7e   :  { %v286_v15 = vsel %vm165_vm1, %v285_v9, %v284_v1  ;;  %v1739_v28 = vadd.s32 4294967294, %v577_v25  ;;  %v373_v44 = vmul.u32 %v369_v14, %v367_v0  ;;  %v2275_v55 = vmul.u32 %v391_v22, %v366_v10 }
  0x7f   :  { %v2252_v38 = vsel %vm2218_vm5, %v2021_v46, %v286_v15  ;;  %vm378_vm8 = vc.u32 %v370_v17, %v374_v32  ;;  %v376_v26 = vshll.u32 %v2262_v13, 16  ;;  %vm312_vm9 = vcmp.eq.s32.totalorder %v2258_v29, 2 }
  0x80   :  { %v291_v56 = vmul.f32 %v2252_v38, %v2252_v38  ;;  %vm1740_vm7 = vcmp.lt.s32.totalorder %v1739_v28, 0  ;;  %v379_v27 = vsel %vm378_vm8, 1, %v1958_v39  ;;  %v392_v62 = vmul.u32 %v390_v60, %v366_v10 }
  0x81   :  { %v580_v41 = vsel %vm1740_vm7, 0, %v1739_v28  ;;  %v2281_v1 = vmul.u32 %v390_v60, %v367_v0  ;;  %vm309_vm10 = vcmp.eq.s32.totalorder %v2258_v29, 0  ;;  %v380_v51 = vadd.s32 %v374_v32, %v370_v17  ;;  %v2298_v28 = vld [vmem:[#allocation7 + $0x70] sm:$0xff] }
  0x82   :  { %v292_v33 = vmul.f32 -0.001358992, %v291_v56  ;;  %v299_v34 = vmul.f32 -0.00019511016, %v291_v56  ;;  %v581_v42 = vsub.s32 32, %v580_v41  ;;  %v582_v52 = vshll.u32 %v2229_v45, %v580_v41  ;;  %1488 = vmatpush.msra.mxu2 %v2298_v28 }
  0x83   :  { %v585_v8 = vsub.s32 4294967266, %v580_v41  ;;  %v396_v4 = vshll.u32 %v2275_v55, 16  ;;  %vm308_vm11 = vcmp.lt.s32.totalorder %v2258_v29, 2  ;;  %vm771_vm12 = vcmp.lt.s32.totalorder %v2264_v23, 2 }
  0x84   :  { %v293_v30 = vadd.f32 0.041655596, %v292_v33  ;;  %v300_v36 = vadd.f32 0.008332121, %v299_v34  ;;  %v583_v63 = vshrl.u32 %v565_v31, %v581_v42  ;;  %vm473_vm13 = vcmp.lt.s32.totalorder %v2034_v53, 0 }
  0x85   :  { %v586_v3 = vadd.s32 127, %v585_v8  ;;  %v375_v45 = vshrl.u32 %v2254_v11, 16  ;;  %v381_v10 = vadd.s32 %v379_v27, %v373_v44  ;;  %vm306_vm14 = vweird.f32 %v2021_v46 }
  0x86   :  { %v294_v61 = vmul.f32 %v293_v30, %v291_v56  ;;  %v301_v43 = vmul.f32 %v300_v36, %v291_v56  ;;  %vm2292_vm15 = vcmp.le.f32.partialorder %v471_v58, 0.7853982  ;;  %v584_v12 = vor.u32 %v583_v63, %v582_v52 }
  0x87   :  { %v587_v14 = vshll.u32 %v586_v3, 23  ;;  %vm382_vm0 = vc.u32 %v380_v51, %v376_v26  ;;  %v395_v15 = vmul.u32 %v391_v22, %v367_v0  ;;  %v398_v17 = vshll.u32 %v2281_v1, 16 }
  0x88   :  { %v295_v9 = vadd.f32 -0.4999988, %v294_v61  ;;  %v302_v16 = vadd.f32 -0.16666654, %v301_v43  ;;  %v383_v25 = vsel %vm382_vm0, 1, %v1958_v39  ;;  %v591_v31 = vcvt.s32.f32 %v584_v12 }
  0x89   :  { %v588_v11 = vor.u32 4788187, %v587_v14  ;;  %v385_v32 = vadd.s32 %v383_v25, %v381_v10  ;;  %vm400_vm1 = vc.u32 %v392_v62, %v396_v4  ;;  %vm775_vm2 = vcmp.eq.s32.totalorder %v2264_v23, 2 }
  0x8a   :  { %v296_v37 = vmul.f32 %v295_v9, %v291_v56  ;;  %v303_v18 = vmul.f32 %v302_v16, %v291_v56  ;;  %v401_v0 = vsel %vm400_vm1, 1, %v1958_v39  ;;  %v355_v56 = vsel %vm351_vm3, %v2188_v19, %v354_v24 }
  0x8b   :  { %v589_v22 = vand.u32 2147483647, %v588_v11  ;;  %v402_v34 = vadd.s32 %v396_v4, %v392_v62  ;;  %v403_v60 = vadd.s32 %v401_v0, %v395_v15  ;;  %v377_v36 = vshrl.u32 %v2262_v13, 16 }
  0x8c   :  { %v297_v58 = vadd.f32 1.0, %v296_v37  ;;  %v304_v33 = vadd.f32 1.0, %v303_v18  ;;  %v386_v41 = vadd.s32 %v385_v32, %v375_v45  ;;  %vm772_vm5 = vcmp.eq.s32.totalorder %v2264_v23, 0 }
  0x8d   :  { %v592_v26 = vmul.f32 %v591_v31, %v589_v22  ;;  %v397_v42 = vshrl.u32 %v2275_v55, 16  ;;  %vm404_vm6 = vc.u32 %v402_v34, %v398_v17  ;;  %v356_v13 = vsel %vm350_vm4, %v2272_v21, %v355_v56 }
  0x8e   :  { %v305_v44 = vmul.f32 %v304_v33, %v2252_v38  ;;  %v313_v30 = vxor.u32 2147483648, %v297_v58  ;;  %v405_v24 = vsel %vm404_vm6, 1, %v1958_v39  ;;  %v399_v27 = vshrl.u32 %v2281_v1, 16 }
  0x8f   :  { %v593_v38 = vxor.u32 2147483648, %v592_v26  ;;  %v407_v61 = vadd.s32 %v405_v24, %v403_v60  ;;  %v387_v62 = vadd.s32 %v386_v41, %v377_v36  ;;  %v406_v63 = vadd.s32 %v402_v34, %v398_v17 }
  0x90   :  { %v310_v52 = vxor.u32 2147483648, %v305_v44  ;;  %v314_v8 = vsel %vm312_vm9, %v313_v30, %v305_v44  ;;  %v777_v19 = vsel %vm775_vm2, %v313_v30, %v305_v44  ;;  %v595_v4 = vsub.s32 4, %v2198_v5 }
  0x91   :  { %v594_v51 = vsel %vm473_vm13, %v593_v38, %v592_v26  ;;  %v408_v20 = vadd.s32 %v407_v61, %v397_v42  ;;  %v410_v10 = vmul.u32 %v2207_v40, %v356_v13  ;;  %vm412_vm3 = vc.u32 %v387_v62, %v406_v63 }
  0x92   :  { %v311_v55 = vsel %vm309_vm10, %v297_v58, %v310_v52  ;;  %v774_v43 = vsel %vm772_vm5, %v297_v58, %v310_v52  ;;  %v597_v29 = vsel %vm2292_vm15, %v2034_v53, %v594_v51  ;;  %v596_v37 = vsel %vm473_vm13, %v595_v4, %v2198_v5 }
  0x93   :  { %v315_v3 = vsel %vm308_vm11, %v311_v55, %v314_v8  ;;  %v778_v39 = vsel %vm771_vm12, %v774_v43, %v777_v19  ;;  %v599_v9 = vmul.f32 %v597_v29, %v597_v29  ;;  %v409_v16 = vadd.s32 %v408_v20, %v399_v27 }
  0x94   :  { %v2329_v21 = vsel %vm306_vm14, nan, %v315_v3  ;;  %v2333_v1 = vsel %vm306_vm14, nan, %v778_v39  ;;  %v598_v32 = vsel %vm2292_vm15, 0, %v596_v37  ;;  %vm614_vm10 = vweird.f32 %v2034_v53  ;;  %v1353_v53 = vld [vmem:[#allocation7 + $0x48] sm:$0xff] }
  0x95   :  { %v2340_v23 = vsub.f32 1.0, %v2329_v21  ;;  %v2344_v45 = vmul.f32 %v2333_v1, %v2023_v47  ;;  %v600_v12 = vmul.f32 -0.001358992, %v599_v9  ;;  %v607_v14 = vmul.f32 -0.00019511016, %v599_v9 }
  0x96   :  { %v413_v15 = vadd.s32 1, %v409_v16  ;;  %v615_v34 = vand.u32 3, %v598_v32  ;;  %v2371_v27 = vmul.f32 %v2029_v50, %v2015_v7  ;;  %v411_v39 = vadd.s32 %v406_v63, %v387_v62 }
  0x97   :  { %v2349_v46 = vmul.f32 %v2340_v23, %v2025_v48  ;;  %v601_v25 = vadd.f32 0.041655596, %v600_v12  ;;  %v608_v17 = vadd.f32 0.008332121, %v607_v14  ;;  %v1079_v62 = vadd.s32 3, %v598_v32 }
  0x98   :  { %v414_v11 = vsel %vm412_vm3, %v413_v15, %v409_v16  ;;  %vm620_vm4 = vcmp.eq.s32.totalorder %v615_v34, 2  ;;  %vm617_vm7 = vcmp.eq.s32.totalorder %v615_v34, 0  ;;  %vm616_vm9 = vcmp.lt.s32.totalorder %v615_v34, 2  ;;  %v1798_v34 = vld [vmem:[#allocation3 + $0x40] sm:$0xff] }
  0x99   :  { %v2356_v18 = vmul.f32 %v2349_v46, %v2027_v49  ;;  %v415_v40 = vadd.s32 %v414_v11, %v410_v10  ;;  %v602_v58 = vmul.f32 %v601_v25, %v599_v9  ;;  %v609_v33 = vmul.f32 %v608_v17, %v599_v9  ;;  %v2387_v17 = vld [vmem:[#allocation7 + $0x68] sm:$0xff] }
  0x9a   :  { %1489 = vmatpush.msra.mxu2 %v2387_v17  ;;  %v1080_v11 = vand.u32 3, %v1079_v62  ;;  %vm319_vm12 = vcmp.lt.s32.totalorder %v2043_v59, 0  ;;  %vm2393_vm13 = vcmp.le.f32.partialorder %v317_v2, 0.7853982  ;;  %v2404_v2 = vmul.f32 %v1798_v34, %v2029_v50 }
  0x9b   :  { %v1138_v31 = vsub.f32 %v2356_v18, %v2344_v45  ;;  %v416_v0 = vadd.s32 536870912, %v415_v40  ;;  %v603_v5 = vadd.f32 -0.4999988, %v602_v58  ;;  %v610_v56 = vadd.f32 -0.16666654, %v609_v33 }
  0x9c   :  { %vm1082_vm14 = vcmp.eq.s32.totalorder %v1080_v11, 0  ;;  %vm1085_vm15 = vcmp.eq.s32.totalorder %v1080_v11, 2  ;;  %vm1081_vm0 = vcmp.lt.s32.totalorder %v1080_v11, 2 }
  0x9d   :  { %v2363_v22 = vsub.f32 %v2196_v35, %v1138_v31  ;;  %1256 = vmatpush.msra.mxu0 %v1138_v31  ;;  %v2365_v60 = vshrl.u32 %v416_v0, 30  ;;  %v604_v44 = vmul.f32 %v603_v5, %v599_v9  ;;  %v611_v30 = vmul.f32 %v610_v56, %v599_v9  ;;  %v1356_v31 = vld [vmem:[#allocation7 + $0x60] sm:$0xff]  ;;  %v1355_v5 = vld [vmem:[#allocation7 + $0x58] sm:$0xff] }
  0x9e   :  { %1490 = vmatpush.msra.mxu2 %v1356_v31  ;;  %v1126_v56 = vmul.f32 %v2349_v46, %v2025_v48 }
  0x9f   :  { %2819 = vst [vmem:[#allocation19_spill] sm:$0xff] %v2363_v22  ;;  %v418_v36 = vshll.u32 %v2365_v60, 30  ;;  %v605_v41 = vadd.f32 1.0, %v604_v44  ;;  %v612_v26 = vadd.f32 1.0, %v611_v30 }
  0xa0   :  { %1491 = vmatpush.msra.mxu2 %v1355_v5 }
  0xa1   :  { %v419_v57 = vsub.s32 %v415_v40, %v418_v36  ;;  %v613_v42 = vmul.f32 %v612_v26, %v597_v29  ;;  %v621_v52 = vxor.u32 2147483648, %v605_v41  ;;  %v441_v36 = vsub.s32 4, %v2365_v60  ;;  %v2412_v26 = vld [vmem:[#allocation7 + $0x50] sm:$0xff] }
  0xa2   :  { %1492 = vmatpush.msra.mxu2 %v2412_v26 }
  0xa3   :  { %vm420_vm8 = vcmp.lt.s32.totalorder %v419_v57, 0  ;;  %v421_v35 = vsub.s32 0, %v419_v57  ;;  %v618_v8 = vxor.u32 2147483648, %v613_v42  ;;  %v622_v19 = vsel %vm620_vm4, %v621_v52, %v613_v42 }
  0xa4   :  { %v1087_v0 = vsel %vm1085_vm15, %v621_v52, %v613_v42  ;;  %v2425_v52 = vadd.f32 %v1126_v56, %v2329_v21  ;;  %1493 = vmatpush.msra.mxu2 %v1353_v53 }
  0xa5   :  { %v422_v24 = vsel %vm420_vm8, %v421_v35, %v419_v57  ;;  %v619_v38 = vsel %vm617_vm7, %v605_v41, %v618_v8  ;;  %v1084_v33 = vsel %vm1082_vm14, %v605_v41, %v618_v8  ;;  %v2427_v35 = vld [vmem:[#allocation7 + $0xc8] sm:$0xff]  ;;  %vm460_vm7 = vweird.f32 %v2043_v59 }
  0xa6   :  { %v423_v13 = vclz %v422_v24  ;;  %v623_v61 = vsel %vm616_vm9, %v619_v38, %v622_v19  ;;  %v1088_v44 = vsel %vm1081_vm0, %v1084_v33, %v1087_v0  ;;  %v2441_v38 = vmul.f32 %v2340_v23, %v2023_v47 }
  0xa7   :  { %v2375_v55 = vsel %vm614_vm10, nan, %v623_v61  ;;  %v1089_v41 = vsel %vm614_vm10, nan, %v1088_v44  ;;  %v1349_v44 = vld [vmem:[#allocation7 + $0x28] sm:$0xff]  ;;  %vm1228_vm9 = vcmask 719872  }
  0xa8   :  { %v1736_v43 = vadd.s32 4294967294, %v423_v13  ;;  %v1092_v3 = vsub.f32 1.0, %v2375_v55  ;;  %v442_v13 = vsel %vm319_vm12, %v441_v36, %v2365_v60  ;;  %v1116_v62 = vmul.f32 %v1089_v41, %v2371_v27 }
  0xaa   :  { %vm1737_vm11 = vcmp.lt.s32.totalorder %v1736_v43, 0  ;;  %v2379_v51 = vmul.f32 %v1092_v3, %v2371_v27  ;;  %v1149_v24 = vmul.f32 %v1092_v3, %v2404_v2 }
  0xab   :  { %v426_v20 = vsel %vm1737_vm11, 0, %v1736_v43  ;;  %v1352_v43 = vld [vmem:[#allocation7 + $0x40] sm:$0xff] }
  0xac   :  { %v427_v4 = vsub.s32 32, %v426_v20  ;;  %v428_v29 = vshll.u32 %v419_v57, %v426_v20  ;;  %v431_v9 = vsub.s32 4294967266, %v426_v20  ;;  %v1128_v7 = vmul.f32 %v2379_v51, %v2371_v27  ;;  %v1370_v57 = vld [vmem:[#allocation7 + $0xd0] sm:$0xff]  ;;  %1494 = vmatpush.msra.mxu2 %v1352_v43 }
  0xad   :  { %1536 = vmatpush.msra.mxu3 %v1370_v57  ;;  %v2450_v20 = vsub.f32 %v1356_v31, %v2425_v52  ;;  %v1350_v31 = vld [vmem:[#allocation7 + $0x30] sm:$0xff] }
  0xae   :  { %v429_v16 = vshrl.u32 %v411_v39, %v427_v4  ;;  %v432_v10 = vadd.s32 127, %v431_v9  ;;  %v1131_v12 = vadd.f32 %v1128_v7, %v2375_v55  ;;  %v1368_v39 = vld [vmem:[#allocation7 + $0xc0] sm:$0xff]  ;;  %v1152_v4 = vmul.f32 %v1149_v24, %v2404_v2 }
  0xaf   :  { %1537 = vmatpush.msra.mxu3 %v2427_v35  ;;  %2823 = vst [vmem:[#allocation21_spill] sm:$0xff] %v2450_v20  ;;  %v2462_v7 = vmul.f32 %v2333_v1, %v2027_v49 }
  0xb0   :  { %v430_v14 = vor.u32 %v429_v16, %v428_v29  ;;  %v433_v15 = vshll.u32 %v432_v10, 23  ;;  %v2385_v37 = vsub.f32 %v2298_v28, %v1131_v12  ;;  %1257 = vmatpush.msra.mxu0 %v1131_v12  ;;  %v2399_v28 = vmul.f32 %v2029_v50, %v2013_v6  ;;  %v2466_v10 = vld [vmem:[#allocation7 + $0x38] sm:$0xff] }
  0xb1   :  { %v2419_v50 = vmul.f32 %v1089_v41, %v2404_v2  ;;  %v2458_v29 = vmul.f32 %v2441_v38, %v2025_v48  ;;  %1538 = vmatpush.msra.mxu3 %v1368_v39  ;;  %v1367_v12 = vld [vmem:[#allocation7 + $0xb8] sm:$0xff]  ;;  %1495 = vmatpush.msra.mxu2 %v2466_v10 }
  0xb2   :  { %2820 = vst [vmem:[#allocation20_spill] sm:$0xff] %v2385_v37  ;;  %v434_v63 = vor.u32 4788187, %v433_v15  ;;  %v437_v25 = vcvt.s32.f32 %v430_v14  ;;  %v2407_v30 = vmul.f32 %v1092_v3, %v2399_v28  ;;  %v444_v14 = vsel %vm2393_vm13, 0, %v442_v13 }
  0xb3   :  { %v1155_v15 = vadd.f32 %v1152_v4, %v2375_v55  ;;  %v2475_v11 = vadd.f32 %v2462_v7, %v2458_v29  ;;  %1539 = vmatpush.msra.mxu3 %v1367_v12  ;;  %v924_v58 = vadd.s32 3, %v444_v14  ;;  %1496 = vmatpush.msra.mxu2 %v1350_v31  ;;  %v2505_v4 = vld [vmem:[#allocation7 + $0x20] sm:$0xff] }
  0xb4   :  { %v435_v40 = vand.u32 2147483647, %v434_v63  ;;  %v2416_v46 = vmul.f32 %v2407_v30, %v2371_v27  ;;  %v1113_v16 = vmul.f32 %v2407_v30, %v2404_v2 }
  0xb5   :  { %v2481_v33 = vsub.f32 %v1370_v57, %v1155_v15  ;;  %1305 = vmatpush.msra.mxu1 %v1155_v15  ;;  %v2486_v56 = vsub.f32 %v1353_v53, %v2475_v11  ;;  %v2496_v57 = vmul.f32 %v2379_v51, %v2404_v2  ;;  %1497 = vmatpush.msra.mxu2 %v1349_v44 }
  0xb6   :  { %v438_v32 = vmul.f32 %v437_v25, %v435_v40  ;;  %v2436_v19 = vadd.f32 %v2419_v50, %v2416_v46  ;;  %v1147_v40 = vmul.f32 %v2340_v23, %v2027_v49  ;;  %v2483_v0 = vadd.f32 %v1116_v62, %v1113_v16  ;;  %v1365_v23 = vld [vmem:[#allocation7 + $0xa8] sm:$0xff] }
  0xb7   :  { %2824 = vst [vmem:[#allocation22_spill] sm:$0xff] %v2481_v33  ;;  %v2513_v51 = vmul.f32 %v2441_v38, %v2027_v49  ;;  %v2517_v2 = vmul.f32 %v2333_v1, %v2025_v48  ;;  %1498 = vmatpush.msra.mxu2 %v2505_v4  ;;  %v2534_v48 = vsub.f32 %v2416_v46, %v2419_v50 }
  0xb8   :  { %v439_v6 = vxor.u32 2147483648, %v438_v32  ;;  %v2453_v3 = vsub.f32 %v1355_v5, %v2436_v19  ;;  %v1150_v34 = vmul.f32 %v1147_v40, %v2027_v49  ;;  %v2492_v36 = vsub.f32 %v1352_v43, %v2483_v0 }
  0xb9   :  { %v925_v43 = vand.u32 3, %v924_v58  ;;  %v2530_v49 = vadd.f32 %v2517_v2, %v2513_v51  ;;  %v1362_v58 = vld [vmem:[#allocation7 + $0x90] sm:$0xff]  ;;  %v2547_v46 = vsub.f32 %v1113_v16, %v1116_v62 }
  0xba   :  { %v440_v42 = vsel %vm319_vm12, %v439_v6, %v438_v32  ;;  %v2479_v32 = vld [vmem:[#allocation7 + $0xb0] sm:$0xff]  ;;  %v2489_v6 = vand.u32 3, %v444_v14  ;;  %v2503_v13 = vadd.f32 %v1150_v34, %v2329_v21 }
  0xbb   :  { %v2432_v8 = vsel %vm2393_vm13, %v2043_v59, %v440_v42  ;;  %v2499_v42 = vmul.f32 %v1089_v41, %v2399_v28  ;;  %1540 = vmatpush.msra.mxu3 %v2479_v32  ;;  %vm930_vm2 = vcmp.eq.s32.totalorder %v925_v43, 2  ;;  %vm927_vm3 = vcmp.eq.s32.totalorder %v925_v43, 0 }
  0xbc   :  { %v445_v61 = vmul.f32 %v2432_v8, %v2432_v8  ;;  %v2520_v15 = vsub.f32 %v1368_v39, %v2503_v13  ;;  %vm466_vm1 = vcmp.eq.s32.totalorder %v2489_v6, 2  ;;  %v2539_v39 = vadd.f32 %v2344_v45, %v2356_v18  ;;  %v2554_v18 = vld [vmem:[#allocation7 + $0x8] sm:$0xff] }
  0xbd   :  { %1541 = vmatpush.msra.mxu3 %v1365_v23  ;;  %vm462_vm5 = vcmp.lt.s32.totalorder %v2489_v6, 2  ;;  %vm463_vm6 = vcmp.eq.s32.totalorder %v2489_v6, 0  ;;  %vm926_vm4 = vcmp.lt.s32.totalorder %v925_v43, 2  ;;  %v2601_v6 = vsub.f32 %v2513_v51, %v2517_v2 }
  0xbe   :  { %v446_v60 = vmul.f32 -0.001358992, %v445_v61  ;;  %v453_v9 = vmul.f32 -0.00019511016, %v445_v61  ;;  %2825 = vst [vmem:[#allocation23_spill] sm:$0xff] %v2520_v15  ;;  %v2552_v45 = vsub.f32 %v1365_v23, %v2539_v39  ;;  %v2567_v23 = vld [vmem:[#allocation7 + $0x80] sm:$0xff]  ;;  %v1098_v15 = vmul.f32 %v2407_v30, %v2399_v28 }
  0xbf   :  { %v2610_v59 = vsub.f32 %v2496_v57, %v2499_v42  ;;  %v1096_v51 = vmul.f32 %v2441_v38, %v2023_v47 }
  0xc0   :  { %v447_v63 = vadd.f32 0.041655596, %v446_v60  ;;  %v454_v25 = vadd.f32 0.008332121, %v453_v9  ;;  %v1364_v60 = vld [vmem:[#allocation7 + $0xa0] sm:$0xff]  ;;  %v2509_v9 = vadd.f32 %v2499_v42, %v2496_v57  ;;  %2827 = vst [vmem:[#allocation25_spill] sm:$0xff] %v2552_v45  ;;  %v2597_v30 = vadd.f32 %v1098_v15, %v2375_v55 }
  0xc1   :  { %1542 = vmatpush.msra.mxu3 %v1364_v60  ;;  %v2559_v16 = vsub.f32 %v1364_v60, %v2547_v46 }
  0xc2   :  { %v448_v27 = vmul.f32 %v447_v63, %v445_v61  ;;  %v455_v5 = vmul.f32 %v454_v25, %v445_v61  ;;  %v1347_v63 = vld [vmem:[#allocation7 + $0x18] sm:$0xff]  ;;  %v2526_v40 = vsub.f32 %v1367_v12, %v2509_v9  ;;  %v1346_v12 = vld [vmem:[#allocation7 + $0x10] sm:$0xff] }
  0xc3   :  { %v2523_v25 = vld [vmem:[#allocation7 + $0x98] sm:$0xff]  ;;  %1499 = vmatpush.msra.mxu2 %v1347_v63  ;;  %2828 = vst [vmem:[#allocation26_spill] sm:$0xff] %v2559_v16 }
  0xc4   :  { %v449_v53 = vadd.f32 -0.4999988, %v448_v27  ;;  %v456_v24 = vadd.f32 -0.16666654, %v455_v5  ;;  %2826 = vst [vmem:[#allocation24_spill] sm:$0xff] %v2526_v40  ;;  %v2542_v27 = vsub.f32 %v1350_v31, %v2530_v49  ;;  %v2545_v5 = vsub.f32 %v1349_v44, %v2534_v48  ;;  %1543 = vmatpush.msra.mxu3 %v2523_v25  ;;  %v2565_v44 = vld [vmem:[#allocation7] sm:$0xff] }
  0xc5   :  { %1500 = vmatpush.msra.mxu2 %v1346_v12 }
  0xc6   :  { %v450_v41 = vmul.f32 %v449_v53, %v445_v61  ;;  %v457_v14 = vmul.f32 %v456_v24, %v445_v61  ;;  %v1361_v53 = vld [vmem:[#allocation7 + $0x88] sm:$0xff]  ;;  %1544 = vmatpush.msra.mxu3 %v1362_v58  ;;  %v1799_v24 = vld [vmem:[#allocation3 + $0x38] sm:$0xff] }
  0xc7   :  { %1501 = vmatpush.msra.mxu2 %v2554_v18  ;;  %v161_v60 = vmul.f32 %v1799_v24, %v2036_v54 }
  0xc8   :  { %v451_v1 = vadd.f32 1.0, %v450_v41  ;;  %v458_v61 = vadd.f32 1.0, %v457_v14  ;;  %v2573_v41 = vsub.f32 %v2458_v29, %v2462_v7  ;;  %1545 = vmatpush.msra.mxu3 %v1361_v53  ;;  %v2575_v14 = vld [vmem:[#allocation9] sm:$0xff]  ;;  %v1801_v7 = vld [vmem:[#allocation3 + $0x8] sm:$0xff] }
  0xc9   :  { %1502 = vmatpush.msra.mxu2 %v2565_v44  ;;  %v155_v24 = vmul.f32 %v1801_v7, %v2036_v54 }
  0xca   :  { %v459_v50 = vmul.f32 %v458_v61, %v2432_v8  ;;  %v467_v34 = vxor.u32 2147483648, %v451_v1  ;;  %v1800_v61 = vld [vmem:[#allocation3 + $0x20] sm:$0xff]  ;;  %1546 = vmatpush.msra.mxu3 %v2567_v23  ;;  %1503 = vmatmul.f32.vlgmr.msra.gmra.mxu2 %v2575_v14 }
  0xcc   :  { %v464_v62 = vxor.u32 2147483648, %v459_v50  ;;  %v468_v8 = vsel %vm466_vm1, %v467_v34, %v459_v50  ;;  %v932_v31 = vsel %vm930_vm2, %v467_v34, %v459_v50  ;;  %v158_v50 = vmul.f32 %v1800_v61, %v2036_v54 }
  0xcd   :  { %v2589_v61 = vsub.f32 %v1347_v63, %v2573_v41  ;;  %v85_v54 = vlaneseq }
  0xce   :  { %v465_v34 = vsel %vm463_vm6, %v451_v1, %v464_v62  ;;  %v929_v33 = vsel %vm927_vm3, %v451_v1, %v464_v62  ;;  %v1373_v62 = vsub.f32 %v1346_v12, %v2597_v30 }
  0xcf   :  { %v469_v29 = vsel %vm462_vm5, %v465_v34, %v468_v8  ;;  %v933_v40 = vsel %vm926_vm4, %v929_v33, %v932_v31  ;;  %v2606_v8 = vsub.f32 %v1362_v58, %v2601_v6  ;;  %v2615_v31 = vsub.f32 %v1361_v53, %v2610_v59  ;;  %v2617_v58 = vld [vmem:[#allocation9 + $0x10] sm:$0xff] }
  0xd0   :  { %v470_v1 = vsel %vm460_vm7, nan, %v469_v29  ;;  %v934_v28 = vsel %vm460_vm7, nan, %v933_v40  ;;  %v86_v45 = vand.u32 127, %v85_v54 }
  0xd1   :  { %v1091_v33 = vsub.f32 1.0, %v470_v1  ;;  %v1106_v43 = vmul.f32 %v934_v28, %v161_v60  ;;  %v1115_v63 = vmul.f32 %v934_v28, %v158_v50  ;;  %2829 = vst [vmem:[#allocation27_spill] sm:$0xff] %v2606_v8  ;;  %v1136_v2 = vmul.f32 %v934_v28, %v155_v24 }
  0xd2   :  { %1506 = vmatmul.f32.gmra.mxu2 %v2617_v58  ;;  %vm89_vm8 = vcmp.lt.s32.totalorder %v86_v45, 16 }
  0xd3   :  { %v1124_v55 = vmul.f32 %v1091_v33, %v158_v50  ;;  %v1094_v15 = vmul.f32 %v1091_v33, %v155_v24  ;;  %v1148_v40 = vmul.f32 %v1091_v33, %v161_v60 }
  0xd5   :  { %v1127_v34 = vmul.f32 %v1124_v55, %v158_v50  ;;  %v1103_v29 = vmul.f32 %v1094_v15, %v158_v50  ;;  %v1151_v12 = vmul.f32 %v1148_v40, %v161_v60  ;;  %v1112_v7 = vmul.f32 %v1094_v15, %v161_v60 }
  0xd6   :  { %v1133_v16 = vmul.f32 %v1124_v55, %v161_v60  ;;  %v1097_v57 = vmul.f32 %v1094_v15, %v155_v24 }
  0xd7   :  { %v1130_v42 = vadd.f32 %v1127_v34, %v470_v1  ;;  %v1121_v8 = vadd.f32 %v1106_v43, %v1103_v29  ;;  %v1154_v22 = vadd.f32 %v1151_v12, %v470_v1  ;;  %v1118_v33 = vadd.f32 %v1115_v63, %v1112_v7  ;;  %v1217_v12 = vld [vmem:[#allocation9 + $0x38] sm:$0xff] }
  0xd8   :  { %v1145_v37 = vadd.f32 %v1136_v2, %v1133_v16  ;;  %v1109_v20 = vsub.f32 %v1103_v29, %v1106_v43  ;;  %v1142_v47 = vsub.f32 %v1112_v7, %v1115_v63  ;;  %v2619_v38 = vadd.f32 %v1097_v57, %v470_v1  ;;  %v1220_v7 = vld [vmem:[#allocation9 + $0x50] sm:$0xff] }
  0xd9   :  { %v2623_v53 = vsub.f32 %v2387_v17, %v1130_v42  ;;  %1258 = vmatpush.msra.mxu0 %v1130_v42  ;;  %v2626_v50 = vsub.f32 %v2412_v26, %v1121_v8  ;;  %v2629_v60 = vsub.f32 %v2427_v35, %v1154_v22  ;;  %v1378_v24 = vsub.f32 %v2466_v10, %v1118_v33  ;;  %v1211_v26 = vld [vmem:[#allocation9 + $0x8] sm:$0xff] }
  0xda   :  { %1306 = vmatpush.msra.mxu1 %v1154_v22  ;;  %v2633_v28 = vsub.f32 %v2479_v32, %v1145_v37  ;;  %v1375_v1 = vsub.f32 %v2505_v4, %v1109_v20  ;;  %v2637_v54 = vsub.f32 %v2523_v25, %v1142_v47  ;;  %v1372_v17 = vsub.f32 %v2554_v18, %v2619_v38  ;;  %v2645_v22 = vld [vmem:[#allocation9 + $0x20] sm:$0xff] }
  0xdb   :  { %1259 = vmatpush.msra.mxu0 %v2425_v52  ;;  %v1099_v10 = vadd.f32 %v1096_v51, %v2329_v21  ;;  %v1139_v32 = vsub.f32 %v1133_v16, %v1136_v2  ;;  %v1959_v4 = vmov 0.0   ;;  %1759 = vmatmul.msk.f32.vlgmr.msra.gmra.mxu3 %vm1228_vm9, %v1211_v26  ;;  %v1400_v52 = vmul.f32 %v1373_v62, %v1373_v62  ;;  %v1213_v16 = vld [vmem:[#allocation9 + $0x18] sm:$0xff] }
  0xdc   :  { %1307 = vmatpush.msra.mxu1 %v2503_v13  ;;  %v1399_v35 = vmul.f32 %v1372_v17, %v1372_v17  ;;  %v2648_v25 = vsel %vm89_vm8, 1.0, %v1959_v4  ;;  %1509 = vmatmul.f32.gmra.mxu2 %v2645_v22  ;;  %v1401_v21 = vmul.f32 %v2589_v61, %v2589_v61  ;;  %v1411_v57 = vmul.f32 %v2623_v53, %v2623_v53 }
  0xdd   :  { %1260 = vmatpush.msra.mxu0 %v2436_v19  ;;  %v1371_v19 = vsub.f32 %v2565_v44, %v1099_v10  ;;  %v2654_v13 = vsub.f32 %v2567_v23, %v1139_v32  ;;  %v1427_v45 = vmul.f32 %v2648_v25, %v1400_v52  ;;  %v2665_v44 = vld [vmem:[#allocation9 + $0x30] sm:$0xff]  ;;  %v1415_v52 = vmul.f32 %v2615_v31, %v2615_v31 }
  0xde   :  { %1308 = vmatpush.msra.mxu1 %v2509_v9 }
  0xdf   :  { %1261 = vmatpush.msra.mxu0 %v1121_v8  ;;  %v1398_v9 = vmul.f32 %v1371_v19, %v1371_v19  ;;  %v2685_v8 = vld [vmem:[#allocation9 + $0x40] sm:$0xff] }
  0xe0   :  { %1309 = vmatpush.msra.mxu1 %v1145_v37  ;;  %v1426_v37 = vmul.f32 %v2648_v25, %v1399_v35 }
  0xe1   :  { %1262 = vmatpush.msra.mxu0 %v2475_v11  ;;  %v1402_v11 = vmul.f32 %v1375_v1, %v1375_v1  ;;  %v1425_v18 = vmul.f32 %v2648_v25, %v1398_v9  ;;  %v1438_v1 = vmul.f32 %v2648_v25, %v1411_v57 }
  0xe2   :  { %1310 = vmatpush.msra.mxu1 %v2539_v39  ;;  %v1428_v39 = vmul.f32 %v2648_v25, %v1401_v21  ;;  %v2833_v21 = vld [vmem:[#allocation27_spill] sm:$0xff] }
  0xe3   :  { %1263 = vmatpush.msra.mxu0 %v2483_v0  ;;  %v1403_v0 = vmul.f32 %v2545_v5, %v2545_v5  ;;  %v1452_v23 = vadd.f32 %v1426_v37, %v1425_v18  ;;  %1760 = vmatmul.msk.f32.gmra.mxu3 %vm1228_vm9, %v1213_v16  ;;  %v1429_v61 = vmul.f32 %v2648_v25, %v1402_v11 }
  0xe4   :  { %1311 = vmatpush.msra.mxu1 %v2547_v46  ;;  %v1404_v46 = vmul.f32 %v2542_v27, %v2542_v27  ;;  %1512 = vmatmul.f32.gmra.mxu2 %v2665_v44  ;;  %v1442_v11 = vmul.f32 %v2648_v25, %v1415_v52  ;;  %v2838_v52 = vld [vmem:[#allocation22_spill] sm:$0xff] }
  0xe5   :  { %1264 = vmatpush.msra.mxu0 %v1118_v33  ;;  %v1453_v43 = vadd.f32 %v1452_v23, %v1427_v45  ;;  %v1430_v5 = vmul.f32 %v2648_v25, %v1403_v0  ;;  %v2831_v33 = vld [vmem:[#allocation20_spill] sm:$0xff]  ;;  %v1224_v0 = vld [vmem:[#allocation9 + $0x70] sm:$0xff] }
  0xe6   :  { %1312 = vmatpush.msra.mxu1 %v1142_v47  ;;  %v1431_v27 = vmul.f32 %v2648_v25, %v1404_v46 }
  0xe7   :  { %1265 = vmatpush.msra.mxu0 %v2530_v49  ;;  %v1405_v49 = vmul.f32 %v1378_v24, %v1378_v24  ;;  %v1454_v63 = vadd.f32 %v1453_v43, %v1428_v39  ;;  %v1225_v43 = vld [vmem:[#allocation9 + $0x78] sm:$0xff] }
  0xe8   :  { %1313 = vmatpush.msra.mxu1 %v2601_v6  ;;  %v1406_v6 = vmul.f32 %v2492_v36, %v2492_v36  ;;  %v1408_v36 = vmul.f32 %v2626_v50, %v2626_v50  ;;  %v2832_v50 = vld [vmem:[#allocation19_spill] sm:$0xff] }
  0xe9   :  { %1266 = vmatpush.msra.mxu0 %v2534_v48  ;;  %v1455_v62 = vadd.f32 %v1454_v63, %v1429_v61  ;;  %v1215_v48 = vld [vmem:[#allocation9 + $0x28] sm:$0xff]  ;;  %v1413_v24 = vmul.f32 %v2832_v50, %v2832_v50  ;;  %v1226_v61 = vld [vmem:[#allocation9 + $0x80] sm:$0xff] }
  0xea   :  { %1314 = vmatpush.msra.mxu1 %v2610_v59  ;;  %v1407_v59 = vmul.f32 %v2486_v56, %v2486_v56  ;;  %v1409_v56 = vmul.f32 %v2453_v3, %v2453_v3  ;;  %v1435_v34 = vmul.f32 %v2648_v25, %v1408_v36 }
  0xeb   :  { %1267 = vmatpush.msra.mxu0 %v1109_v20  ;;  %v1432_v20 = vmul.f32 %v2648_v25, %v1405_v49  ;;  %v1456_v55 = vadd.f32 %v1455_v62, %v1430_v5  ;;  %1761 = vmatmul.msk.f32.gmra.mxu3 %vm1228_vm9, %v1215_v48  ;;  %v1440_v4 = vmul.f32 %v2648_v25, %v1413_v24  ;;  %v1227_v49 = vld [vmem:[#allocation9 + $0x88] sm:$0xff] }
  0xec   :  { %1315 = vmatpush.msra.mxu1 %v1139_v32  ;;  %1515 = vmatmul.f32.gmra.mxu2 %v2685_v8  ;;  %v1434_v40 = vmul.f32 %v2648_v25, %v1407_v59  ;;  %v1436_v3 = vmul.f32 %v2648_v25, %v1409_v56  ;;  %v1222_v32 = vld [vmem:[#allocation9 + $0x60] sm:$0xff] }
  0xed   :  { %1268 = vmatpush.msra.mxu0 %v2573_v41  ;;  %1750 = vmatmul.msk.f32.vlgmr.msra.gmra.mxu1 %vm1228_vm9, %v1211_v26  ;;  %v1433_v41 = vmul.f32 %v2648_v25, %v1406_v6  ;;  %v1457_v15 = vadd.f32 %v1456_v55, %v1431_v27  ;;  %v1414_v26 = vmul.f32 %v2654_v13, %v2654_v13 }
  0xee   :  { %v1417_v13 = vmul.f32 %v2637_v54, %v2637_v54 }
  0xef   :  { %1269 = vmatpush.msra.mxu0 %v2597_v30  ;;  %v1458_v51 = vadd.f32 %v1457_v15, %v1432_v20  ;;  %v2830_v30 = vld [vmem:[#allocation21_spill] sm:$0xff]  ;;  %v1441_v37 = vmul.f32 %v2648_v25, %v1414_v26  ;;  %v2834_v15 = vld [vmem:[#allocation26_spill] sm:$0xff] }
  0xf0   :  { %v1410_v2 = vmul.f32 %v2830_v30, %v2830_v30  ;;  %v1444_v39 = vmul.f32 %v2648_v25, %v1417_v13  ;;  %v1418_v56 = vmul.f32 %v2834_v15, %v2834_v15  ;;  %v2835_v30 = vld [vmem:[#allocation25_spill] sm:$0xff] }
  0xf1   :  { %1270 = vmatpush.msra.mxu0 %v2619_v38  ;;  %v1459_v29 = vadd.f32 %v1458_v51, %v1433_v41 }
  0xf2   :  { %v1437_v47 = vmul.f32 %v2648_v25, %v1410_v2  ;;  %v1419_v2 = vmul.f32 %v2835_v30, %v2835_v30 }
  0xf3   :  { %1271 = vmatpush.msra.mxu0 %v1099_v10  ;;  %v1460_v42 = vadd.f32 %v1459_v29, %v1434_v40  ;;  %1762 = vmatmul.msk.f32.gmra.mxu3 %vm1228_vm9, %v1217_v12  ;;  %v1219_v10 = vld [vmem:[#allocation9 + $0x48] sm:$0xff] }
  0xf4   :  { %1272 = vmatmul.f32.vlgmr.msra.gmra.mxu0 %v2575_v14  ;;  %v1412_v14 = vmul.f32 %v2831_v33, %v2831_v33  ;;  %1518 = vmatmul.f32.gmra.mxu2 %v1220_v7  ;;  %v1446_v33 = vmul.f32 %v2648_v25, %v1419_v2 }
  0xf5   :  { %1751 = vmatmul.msk.f32.gmra.mxu1 %vm1228_vm9, %v1213_v16  ;;  %v1461_v38 = vadd.f32 %v1460_v42, %v1435_v34  ;;  %v1221_v16 = vld [vmem:[#allocation9 + $0x58] sm:$0xff] }
  0xf6   :  { %v1439_v53 = vmul.f32 %v2648_v25, %v1412_v14  ;;  %v2837_v14 = vld [vmem:[#allocation23_spill] sm:$0xff] }
  0xf7   :  { %v1462_v17 = vadd.f32 %v1461_v38, %v1436_v3  ;;  %v2836_v3 = vld [vmem:[#allocation24_spill] sm:$0xff] }
  0xf8   :  { %v1421_v42 = vmul.f32 %v2836_v3, %v2836_v3 }
  0xf9   :  { %v1463_v35 = vadd.f32 %v1462_v17, %v1437_v47  ;;  %v1422_v47 = vmul.f32 %v2837_v14, %v2837_v14 }
  0xfb   :  { %v1464_v19 = vadd.f32 %v1463_v35, %v1438_v1  ;;  %1763 = vmatmul.msk.f32.gmra.mxu3 %vm1228_vm9, %v1219_v10  ;;  %v1423_v35 = vmul.f32 %v2629_v60, %v2629_v60 }
  0xfc   :  { %1275 = vmatmul.f32.gmra.mxu0 %v2617_v58  ;;  %v1416_v58 = vmul.f32 %v2833_v21, %v2833_v21  ;;  %1521 = vmatmul.f32.gmra.mxu2 %v1222_v32 }
  0xfd   :  { %1752 = vmatmul.msk.f32.gmra.mxu1 %vm1228_vm9, %v1215_v48  ;;  %v1465_v9 = vadd.f32 %v1464_v19, %v1439_v53  ;;  %v1424_v19 = vmul.f32 %v2838_v52, %v2838_v52 }
  0xfe   :  { %v1443_v31 = vmul.f32 %v2648_v25, %v1416_v58  ;;  %v1450_v58 = vmul.f32 %v2648_v25, %v1423_v35 }
  0xff   :  { %v1466_v45 = vadd.f32 %v1465_v9, %v1440_v4 }
 0x101   :  { %v1467_v18 = vadd.f32 %v1466_v45, %v1441_v37 }
 0x103   :  { %v1468_v23 = vadd.f32 %v1467_v18, %v1442_v11  ;;  %1764 = vmatmul.msk.f32.gmra.mxu3 %vm1228_vm9, %v1221_v16  ;;  %v1451_v11 = vmul.f32 %v2648_v25, %v1424_v19  ;;  %v1634_v19 = vld [vmem:[#allocation10 + $0x30] sm:$0xff] }
 0x104   :  { %1278 = vmatmul.f32.gmra.mxu0 %v2645_v22  ;;  %1524 = vmatmul.f32.gmra.mxu2 %v1224_v0  ;;  %v1223_v22 = vld [vmem:[#allocation9 + $0x68] sm:$0xff] }
 0x105   :  { %1753 = vmatmul.msk.f32.gmra.mxu1 %vm1228_vm9, %v1217_v12  ;;  %v1469_v46 = vadd.f32 %v1468_v23, %v1443_v31  ;;  %v1420_v12 = vmul.f32 %v2633_v28, %v2633_v28  ;;  %v1448_v28 = vmul.f32 %v2648_v25, %v1421_v42  ;;  %v1632_v42 = vld [vmem:[#allocation10 + $0x20] sm:$0xff] }
 0x107   :  { %v1470_v54 = vadd.f32 %v1469_v46, %v1444_v39  ;;  %v1447_v38 = vmul.f32 %v2648_v25, %v1420_v12 }
 0x10b   :  { %1765 = vmatmul.msk.f32.gmra.mxu3 %vm1228_vm9, %v1223_v22 }
 0x10c   :  { %1281 = vmatmul.f32.gmra.mxu0 %v2665_v44  ;;  %1527 = vmatmul.f32.gmra.mxu2 %v1226_v61 }
 0x10d   :  { %1754 = vmatmul.msk.f32.gmra.mxu1 %vm1228_vm9, %v1219_v10  ;;  %v1449_v10 = vmul.f32 %v2648_v25, %v1422_v47 }
 0x113   :  { %1766 = vmatmul.msk.f32.gmra.mxu3 %vm1228_vm9, %v1225_v43 }
 0x114   :  { %1284 = vmatmul.f32.gmra.mxu0 %v2685_v8 }
 0x115   :  { %1755 = vmatmul.msk.f32.gmra.mxu1 %vm1228_vm9, %v1221_v16 }
 0x11b   :  { %1767 = vmatmul.msk.f32.gmra.mxu3 %vm1228_vm9, %v1227_v49 }
 0x11c   :  { %1287 = vmatmul.f32.gmra.mxu0 %v1220_v7  ;;  %v1445_v7 = vmul.f32 %v2648_v25, %v1418_v56  ;;  %v1630_v56 = vld [vmem:[#allocation10 + $0x10] sm:$0xff] }
 0x11d   :  { %1756 = vmatmul.msk.f32.gmra.mxu1 %vm1228_vm9, %v1223_v22 }
 0x11e   :  { %v1471_v50 = vadd.f32 %v1470_v54, %v1445_v7 }
 0x120   :  { %v1472_v17 = vadd.f32 %v1471_v50, %v1446_v33 }
 0x122   :  { %v1473_v4 = vadd.f32 %v1472_v17, %v1447_v38 }
 0x124   :  { %1290 = vmatmul.f32.gmra.mxu0 %v1222_v32  ;;  %v1474_v21 = vadd.f32 %v1473_v4, %v1448_v28 }
 0x125   :  { %1757 = vmatmul.msk.f32.gmra.mxu1 %vm1228_vm9, %v1225_v43 }
 0x126   :  { %v1475_v37 = vadd.f32 %v1474_v21, %v1449_v10 }
 0x128   :  { %v1476_v31 = vadd.f32 %v1475_v37, %v1450_v58 }
 0x12a   :  { %v1477_v16 = vadd.f32 %v1476_v31, %v1451_v11 }
 0x12c   :  { %1293 = vmatmul.f32.gmra.mxu0 %v1224_v0  ;;  %1478 = vadd.xlane.f32.xlu0 %v1477_v16 }
 0x12d   :  { %1758 = vmatmul.msk.f32.gmra.mxu1 %vm1228_vm9, %v1227_v49 }
 0x134   :  { %1296 = vmatmul.f32.gmra.mxu0 %v1226_v61  ;;  %v1629_v61 = vld [vmem:[#allocation10 + $0x8] sm:$0xff] }
 0x14d   :  { %v1504_v44 = vpop.f32.mrf.mxu2 }
 0x155   :  { %v1507_v5 = vpop.f32.mrf.mxu2 }
 0x15e   :  { %v1548_v63 = vpop.f32.mrf.mxu3 }
 0x15f   :  { %v2745_v6 = vadd.f32 %v1548_v63, %v1504_v44  ;;  %v1510_v27 = vpop.f32.mrf.mxu2  ;;  %v1628_v44 = vld [vmem:[#allocation10] sm:$0xff] }
 0x161   :  { %1619 = vst [vmem:[#allocation13] sm:$0xff] %v2745_v6 }
 0x166   :  { %v1551_v48 = vpop.f32.mrf.mxu3 }
 0x167   :  { %v2748_v8 = vadd.f32 %v1551_v48, %v1507_v5  ;;  %v1513_v59 = vpop.f32.mrf.mxu2 }
 0x169   :  { %1620 = vst [vmem:[#allocation13 + $0x8] sm:$0xff] %v2748_v8 }
 0x16a   :  { %v1317_v62 = vpop.f32.mrf.mxu1 }
 0x16e   :  { %v1554_v36 = vpop.f32.mrf.mxu3 }
 0x16f   :  { %v2751_v41 = vadd.f32 %v1554_v36, %v1510_v27  ;;  %v1516_v51 = vpop.f32.mrf.mxu2 }
 0x171   :  { %v1273_v20 = vpop.f32.mrf.mxu0  ;;  %1621 = vst [vmem:[#allocation13 + $0x10] sm:$0xff] %v2751_v41 }
 0x172   :  { %v1320_v55 = vpop.f32.mrf.mxu1  ;;  %v1318_v49 = vadd.f32 %v1317_v62, %v1273_v20 }
 0x174   :  { %v1637_v36 = vsub.f32 %v1628_v44, %v1318_v49  ;;  %v1575_v30 = vsub.f32 %v2745_v6, %v1318_v49  ;;  %v1633_v6 = vld [vmem:[#allocation10 + $0x28] sm:$0xff] }
 0x176   :  { %v1557_v29 = vpop.f32.mrf.mxu3  ;;  %v1646_v7 = vmul.f32 %v1637_v36, %v1637_v36  ;;  %v1584_v47 = vmul.f32 %v1575_v30, %v1575_v30 }
 0x177   :  { %v2761_v57 = vadd.f32 %v1557_v29, %v1513_v59  ;;  %v1519_v26 = vpop.f32.mrf.mxu2  ;;  %v1631_v29 = vld [vmem:[#allocation10 + $0x18] sm:$0xff] }
 0x178   :  { %v1593_v21 = vmul.f32 %v2648_v25, %v1584_v47 }
 0x179   :  { %v1276_v40 = vpop.f32.mrf.mxu0  ;;  %1622 = vst [vmem:[#allocation13 + $0x18] sm:$0xff] %v2761_v57 }
 0x17a   :  { %v1323_v34 = vpop.f32.mrf.mxu1  ;;  %v1321_v22 = vadd.f32 %v1320_v55, %v1276_v40 }
 0x17c   :  { %v1638_v27 = vsub.f32 %v1629_v61, %v1321_v22  ;;  %v1576_v15 = vsub.f32 %v2748_v8, %v1321_v22 }
 0x17e   :  { %v1560_v53 = vpop.f32.mrf.mxu3  ;;  %v1647_v2 = vmul.f32 %v1638_v27, %v1638_v27  ;;  %v1585_v3 = vmul.f32 %v1576_v15, %v1576_v15 }
 0x17f   :  { %v1561_v32 = vadd.f32 %v1560_v53, %v1516_v51  ;;  %v1522_v60 = vpop.f32.mrf.mxu2  ;;  %v1655_v53 = vmul.f32 %v2648_v25, %v1646_v7 }
 0x180   :  { %v1656_v38 = vmul.f32 %v2648_v25, %v1647_v2 }
 0x181   :  { %v1279_v24 = vpop.f32.mrf.mxu0  ;;  %1623 = vst [vmem:[#allocation13 + $0x20] sm:$0xff] %v1561_v32 }
 0x182   :  { %v1326_v1 = vpop.f32.mrf.mxu1  ;;  %v1324_v59 = vadd.f32 %v1323_v34, %v1279_v24  ;;  %v1664_v58 = vadd.f32 %v1656_v38, %v1655_v53 }
 0x184   :  { %v1639_v55 = vsub.f32 %v1630_v56, %v1324_v59  ;;  %v1577_v40 = vsub.f32 %v2751_v41, %v1324_v59 }
 0x186   :  { %v1563_v45 = vpop.f32.mrf.mxu3  ;;  %v1648_v24 = vmul.f32 %v1639_v55, %v1639_v55  ;;  %v1586_v28 = vmul.f32 %v1577_v40, %v1577_v40  ;;  %v1636_v55 = vld [vmem:[#allocation10 + $0x40] sm:$0xff] }
 0x187   :  { %v1564_v18 = vadd.f32 %v1563_v45, %v1519_v26  ;;  %v1525_v54 = vpop.f32.mrf.mxu2  ;;  %v1594_v26 = vmul.f32 %v2648_v25, %v1585_v3  ;;  %v1635_v45 = vld [vmem:[#allocation10 + $0x38] sm:$0xff] }
 0x188   :  { %v1657_v37 = vmul.f32 %v2648_v25, %v1648_v24 }
 0x189   :  { %v1282_v9 = vpop.f32.mrf.mxu0  ;;  %1624 = vst [vmem:[#allocation13 + $0x28] sm:$0xff] %v1564_v18  ;;  %v1602_v31 = vadd.f32 %v1594_v26, %v1593_v21 }
 0x18a   :  { %v1329_v13 = vpop.f32.mrf.mxu1  ;;  %v1327_v51 = vadd.f32 %v1326_v1, %v1282_v9  ;;  %v1595_v9 = vmul.f32 %v2648_v25, %v1586_v28 }
 0x18c   :  { %v1640_v34 = vsub.f32 %v1631_v29, %v1327_v51  ;;  %v1578_v33 = vsub.f32 %v2761_v57, %v1327_v51  ;;  %v1603_v49 = vadd.f32 %v1602_v31, %v1595_v9 }
 0x18e   :  { %v1566_v23 = vpop.f32.mrf.mxu3  ;;  %v1649_v10 = vmul.f32 %v1640_v34, %v1640_v34  ;;  %v1587_v57 = vmul.f32 %v1578_v33, %v1578_v33 }
 0x18f   :  { %v1567_v46 = vadd.f32 %v1566_v23, %v1522_v60  ;;  %v1528_v12 = vpop.f32.mrf.mxu2 }
 0x191   :  { %v1285_v0 = vpop.f32.mrf.mxu0  ;;  %1625 = vst [vmem:[#allocation13 + $0x30] sm:$0xff] %v1567_v46 }
 0x192   :  { %v1332_v39 = vpop.f32.mrf.mxu1  ;;  %v1330_v62 = vadd.f32 %v1329_v13, %v1285_v0 }
 0x194   :  { %v1641_v1 = vsub.f32 %v1632_v42, %v1330_v62  ;;  %v1579_v41 = vsub.f32 %v1561_v32, %v1330_v62 }
 0x196   :  { %v1569_v63 = vpop.f32.mrf.mxu3  ;;  %v1650_v32 = vmul.f32 %v1641_v1, %v1641_v1  ;;  %v1588_v13 = vmul.f32 %v1579_v41, %v1579_v41 }
 0x197   :  { %v1570_v48 = vadd.f32 %v1569_v63, %v1525_v54 }
 0x198   :  { %v1659_v44 = vmul.f32 %v2648_v25, %v1650_v32 }
 0x199   :  { %v1288_v43 = vpop.f32.mrf.mxu0  ;;  %1626 = vst [vmem:[#allocation13 + $0x38] sm:$0xff] %v1570_v48 }
 0x19a   :  { %v1335_v5 = vpop.f32.mrf.mxu1  ;;  %v1333_v8 = vadd.f32 %v1332_v39, %v1288_v43  ;;  %v1658_v39 = vmul.f32 %v2648_v25, %v1649_v10  ;;  %v1665_v43 = vadd.f32 %v1664_v58, %v1657_v37 }
 0x19c   :  { %v1642_v4 = vsub.f32 %v1633_v6, %v1333_v8  ;;  %v1580_v52 = vsub.f32 %v1564_v18, %v1333_v8  ;;  %v1596_v18 = vmul.f32 %v2648_v25, %v1587_v57  ;;  %v1666_v59 = vadd.f32 %v1665_v43, %v1658_v39 }
 0x19e   :  { %v1572_v14 = vpop.f32.mrf.mxu3  ;;  %v1651_v23 = vmul.f32 %v1642_v4, %v1642_v4  ;;  %v1589_v54 = vmul.f32 %v1580_v52, %v1580_v52  ;;  %v1604_v36 = vadd.f32 %v1603_v49, %v1596_v18  ;;  %v1667_v2 = vadd.f32 %v1666_v59, %v1659_v44 }
 0x19f   :  { %v1573_v50 = vadd.f32 %v1572_v14, %v1528_v12 }
 0x1a0   :  { %v1598_v15 = vmul.f32 %v2648_v25, %v1589_v54 }
 0x1a1   :  { %v1291_v20 = vpop.f32.mrf.mxu0  ;;  %1627 = vst [vmem:[#allocation13 + $0x40] sm:$0xff] %v1573_v50 }
 0x1a2   :  { %v1338_v17 = vpop.f32.mrf.mxu1  ;;  %v1336_v35 = vadd.f32 %v1335_v5, %v1291_v20  ;;  %v1597_v5 = vmul.f32 %v2648_v25, %v1588_v13  ;;  %1714 = dma.vmem_to_hbm [thread:$0]  %s1707_s3, 1152, %s1709_s17, [#allocation5], %s1945_s26, %s1945_s26, %s1946_s27  }
 0x1a4   :  { %v1643_v60 = vsub.f32 %v1634_v19, %v1336_v35  ;;  %v1581_v16 = vsub.f32 %v1567_v46, %v1336_v35  ;;  %v1660_v46 = vmul.f32 %v2648_v25, %v1651_v23  ;;  %v1605_v29 = vadd.f32 %v1604_v36, %v1597_v5 }
 0x1a6   :  { %v1652_v63 = vmul.f32 %v1643_v60, %v1643_v60  ;;  %v1590_v27 = vmul.f32 %v1581_v16, %v1581_v16  ;;  %v1606_v12 = vadd.f32 %v1605_v29, %v1598_v15  ;;  %v1668_v7 = vadd.f32 %v1667_v2, %v1660_v46 }
 0x1a8   :  { %v1661_v40 = vmul.f32 %v2648_v25, %v1652_v63  ;;  %v1599_v62 = vmul.f32 %v2648_v25, %v1590_v27 }
 0x1a9   :  { %v1294_v11 = vpop.f32.mrf.mxu0 }
 0x1aa   :  { %v1339_v0 = vadd.f32 %v1338_v17, %v1294_v11  ;;  %v1341_v56 = vpop.f32.mrf.mxu1  ;;  %v1669_v47 = vadd.f32 %v1668_v7, %v1661_v40  ;;  %v1607_v38 = vadd.f32 %v1606_v12, %v1599_v62 }
 0x1ac   :  { %v1644_v22 = vsub.f32 %v1635_v45, %v1339_v0  ;;  %v1582_v61 = vsub.f32 %v1570_v48, %v1339_v0 }
 0x1ae   :  { %v1653_v51 = vmul.f32 %v1644_v22, %v1644_v22  ;;  %v1591_v30 = vmul.f32 %v1582_v61, %v1582_v61 }
 0x1b0   :  { %v1600_v3 = vmul.f32 %v2648_v25, %v1591_v30  ;;  %v1662_v33 = vmul.f32 %v2648_v25, %v1653_v51 }
 0x1b1   :  { %v1297_v48 = vpop.f32.mrf.mxu0 }
 0x1b2   :  { %v1342_v20 = vadd.f32 %v1341_v56, %v1297_v48  ;;  %v1670_v24 = vadd.f32 %v1669_v47, %v1662_v33  ;;  %v1608_v1 = vadd.f32 %v1607_v38, %v1600_v3 }
 0x1b4   :  { %v1645_v42 = vsub.f32 %v1636_v55, %v1342_v20  ;;  %v1583_v34 = vsub.f32 %v1573_v50, %v1342_v20  ;;  %v1479_v50 = vpop.xlane.xlu0 %1478 }
 0x1b5   :  { %v1480_v53 = vrot.slane %v1479_v50, 4 }
 0x1b6   :  { %v1654_v8 = vmul.f32 %v1645_v42, %v1645_v42  ;;  %v1592_v14 = vmul.f32 %v1583_v34, %v1583_v34 }
 0x1b8   :  { %v1663_v6 = vmul.f32 %v2648_v25, %v1654_v8  ;;  %v1601_v28 = vmul.f32 %v2648_v25, %v1592_v14  ;;  %v1481_v25 = vadd.f32 %v1480_v53, %v1479_v50 }
 0x1ba   :  { %v1671_v41 = vadd.f32 %v1670_v24, %v1663_v6  ;;  %v1609_v17 = vadd.f32 %v1608_v1, %v1601_v28  ;;  %v1482_v26 = vrot.slane %v1481_v25, 2 }
 0x1bc   :  { %1672 = vadd.xlane.f32.xlu1 %v1671_v41  ;;  %1610 = vadd.xlane.f32.xlu0 %v1609_v17  ;;  %v1483_v35 = vadd.f32 %v1482_v26, %v1481_v25 }
 0x1be   :  { %v1484_v10 = vrot.slane %v1483_v35, 1 }
 0x1c0   :  { %v1485_v57 = vadd.f32 %v1484_v10, %v1483_v35 }
 0x1c2   :  { %1768 = vpush %v1485_v57 }
 0x1f3   :  { %s1769_s5 = spop %1768 }
 0x1f4   :  { %1682 = sst [smem:[#allocation12]] %s1769_s5 }
 0x22f   :  { %v1673_v4 = vpop.xlane.xlu1 %1672  ;;  %v1611_v52 = vpop.xlane.xlu0 %1610 }
 0x230   :  { %v1674_v19 = vrot.slane %v1673_v4, 4  ;;  %v1612_v21 = vrot.slane %v1611_v52, 4 }
 0x232   :  { %v1675_v58 = vadd.f32 %v1674_v19, %v1673_v4  ;;  %v1613_v37 = vadd.f32 %v1612_v21, %v1611_v52 }
 0x234   :  { %v1676_v9 = vrot.slane %v1675_v58, 2  ;;  %v1614_v32 = vrot.slane %v1613_v37, 2 }
 0x236   :  { %v1677_v13 = vadd.f32 %v1676_v9, %v1675_v58  ;;  %v1615_v11 = vadd.f32 %v1614_v32, %v1613_v37 }
 0x238   :  { %v1616_v45 = vrot.slane %v1615_v11, 1  ;;  %v1678_v31 = vrot.slane %v1677_v13, 1 }
 0x23a   :  { %v1617_v60 = vadd.f32 %v1616_v45, %v1615_v11  ;;  %v1679_v16 = vadd.f32 %v1678_v31, %v1677_v13 }
 0x23c   :  { %1770 = vpush %v1617_v60 }
 0x23d   :  { %1772 = vpush %v1679_v16 }
 0x26d   :  { %s1771_s21 = spop %1770 }
 0x26e   :  { %1687 = sst [smem:[#allocation12 + $0x80]] %s1771_s21  ;;  %s1773_s22 = spop %1772 }
 0x26f   :  { %1692 = sst [smem:[#allocation12 + $0x100]] %s1773_s22 }
 0x270   :  { %1701 = dma.smem_to_vmem %s1961_s23, 64, %s1699_s20, [#allocation6]  }
 0x271   :  { %1940 = dma.done.wait [#allocation6], 64  }
 0x272   :  { %1941 = vsyncadd [#allocation6], 4294967232 }
 0x273   :  { %1942 = dma.done.wait [#allocation5], 1152  }
 0x274   :  { %1943 = vsyncadd [#allocation5], 4294966144 }
 0x275   :  { %1723 = sfence }
 0x276   :  { %1724 = vsyncpa [#allocation4], 1 }
 0x277   :  { %1725 = vsyncpa [#allocation8], 1 }
 0x278   :  { %1726 = vsyncpa [#allocation11], 1 }
 0x279   :  { %1727 = vsyncpa [#allocation5], 1 }
 0x27a   :  { %1728 = vsyncpa [#allocation6], 1 }

</bundles_post_ra>
